<compile_context>
chip_gen: v7x
topology: tpu7x:2x2x1
jax: 0.10.0
libtpu: 0.0.40
codegen_flags: <defaults>
</compile_context>

<pallas_src>
import functools
import math

import jax
import jax.numpy as jnp
from jax.experimental import pallas as pl
from jax.experimental.pallas import tpu as pltpu


def _round_up(x, m):
    return (x + m - 1) // m * m


def _nlk_kernel(loff_ref, z_ref, w1_ref, b1_ref, w2_ref, b2_ref, o_ref, *,
                approx_reciprocal):
    n_z, tb, d = z_ref.shape
    cdt = w1_ref.dtype  # MXU compute dtype (bf16 by default)

    w1 = w1_ref[...]
    b1 = b1_ref[...]
    w2 = w2_ref[...]
    b2 = b2_ref[...]

    def mlp(x2d):
        # bf16 cast happens HERE (on the VPU, hidden under the activation DMA),
        # so the kernel reads the original f32 activations straight from HBM.
        h = jnp.dot(x2d.astype(cdt), w1, preferred_element_type=jnp.float32)
        h = jnp.maximum(h + b1, 0.0)
        y = jnp.dot(h.astype(cdt), w2, preferred_element_type=jnp.float32)
        return y + b2

    # loffset branch: (tb, d) f32 logits.
    logit_l = mlp(loff_ref[...])
    # z branch: collapse leading dims (layout-free: tb is a multiple of the
    # sublane packing) so each layer is ONE MXU pass with M = n_z * tb.
    logit_z = mlp(z_ref[...].reshape(n_z * tb, d)).reshape(n_z, tb, d)

    # Numerically stable softmax over the (fused) concat axis.  The full K axis
    # lives inside this block, so no cross-step state is needed.
    m = jnp.maximum(logit_l, jnp.max(logit_z, axis=0))          # (tb, d)
    e_l = jnp.exp(logit_l - m)
    e_z = jnp.exp(logit_z - m[None])
    denom = e_l + jnp.sum(e_z, axis=0)
    inv = pl.reciprocal(denom, approx=approx_reciprocal)        # EUP slot (cheap)

    o_ref[0] = (e_l * inv).astype(o_ref.dtype)
    o_ref[pl.ds(1, n_z)] = (e_z * inv[None]).astype(o_ref.dtype)


def nlk_difference_offset(loffset, z, w1, b1, w2, b2, *, tb=512,
                          compute_dtype=jnp.bfloat16,
                          out_dtype=jnp.bfloat16,
                          approx_reciprocal=True):
    """loffset: (B, D); z: (N, B, D); w1: (D, H); b1: (1, H); w2: (H, D); b2: (1, D).

    Weights are stored transposed vs PyTorch (in_features, out_features).
    Returns softmax(layer2(relu(layer1(concat([loffset[None], z])))), axis=0) with
    shape (N + 1, B, D), dtype `out_dtype` (bf16 default; values lie in [0, 1]).
    Accuracy is bounded by bf16 operands + f32 accumulation (~3e-3 relative);
    set approx_reciprocal=False if exact column normalization matters downstream.
    """
    B, D = loffset.shape
    N = z.shape[0]
    K = N + 1
    H = w1.shape[1]

    # --- batch tile: multiple of 16 (keeps the in-kernel reshape layout-free for
    # both f32 and bf16 packing).  Ragged last tile is handled by Pallas masked
    # stores, so NO pad / slice HBM passes are needed. ---
    if B <= 16:
        tb_eff = B                                   # tiny batch: single full block
    else:
        tb_eff = _round_up(min(tb, _round_up(B, 16)), 16)
        if pl.cdiv(B, tb_eff) < 2:
            # keep >= 2 grid steps so both v7x TensorCores get work
            tb_eff = _round_up(pl.cdiv(B, 2), 16)
    grid = pl.cdiv(B, tb_eff)

    # --- weights / biases: tiny, so pad the hidden dim to a 128-lane multiple and
    # cast once here.  Padded hidden columns carry zero weights + zero bias, so
    # relu(0)=0 contributes nothing to layer2.  The feature dim D is left as-is
    # (activation blocks take the full D). ---
    Hp = _round_up(H, 128)
    if Hp != H:
        w1 = jnp.pad(w1, ((0, 0), (0, Hp - H)))
        b1 = jnp.pad(b1, ((0, 0), (0, Hp - H)))
        w2 = jnp.pad(w2, ((0, Hp - H), (0, 0)))
    w1 = w1.astype(compute_dtype)
    w2 = w2.astype(compute_dtype)
    b1 = b1.astype(jnp.float32)
    b2 = b2.astype(jnp.float32)

    x_bytes = loffset.dtype.itemsize
    out_bytes = jnp.dtype(out_dtype).itemsize
    w_bytes = jnp.dtype(compute_dtype).itemsize

    # Rough per-step VMEM working set (double-buffered activation/output blocks,
    # resident weights, f32 intermediates) -> scoped-VMEM limit with headroom.
    step_bytes = (
        2 * tb_eff * D * x_bytes                      # loffset blocks
        + 2 * N * tb_eff * D * x_bytes                # z blocks
        + 2 * K * tb_eff * D * out_bytes              # output blocks
        + 2 * (2 * D * Hp * w_bytes + (Hp + D) * 4)   # weights / biases
        + K * tb_eff * Hp * 6                         # h (f32 + bf16)
        + 3 * K * tb_eff * D * 4                      # logits / exp / scaled
    )
    vmem_limit = int(min(max(step_bytes * 3 // 2, 32 << 20), 56 << 20))

    cost = pl.CostEstimate(
        flops=4 * K * B * D * Hp,
        transcendentals=(K + 1) * B * D,
        bytes_accessed=(K * B * D * x_bytes + K * B * D * out_bytes
                        + 2 * D * Hp * w_bytes + (Hp + D) * 4),
    )

    kernel = functools.partial(_nlk_kernel, approx_reciprocal=approx_reciprocal)

    return pl.pallas_call(
        kernel,
        out_shape=jax.ShapeDtypeStruct((K, B, D), out_dtype),
        grid_spec=pl.GridSpec(
            grid=(grid,),
            in_specs=[
                pl.BlockSpec((tb_eff, D), lambda i: (i, 0)),        # loffset (tiled)
                pl.BlockSpec((N, tb_eff, D), lambda i: (0, i, 0)),  # z       (tiled)
                pl.BlockSpec((D, Hp), lambda i: (0, 0)),            # w1 (resident)
                pl.BlockSpec((1, Hp), lambda i: (0, 0)),            # b1 (resident)
                pl.BlockSpec((Hp, D), lambda i: (0, 0)),            # w2 (resident)
                pl.BlockSpec((1, D), lambda i: (0, 0)),             # b2 (resident)
            ],
            out_specs=pl.BlockSpec((K, tb_eff, D), lambda i: (0, i, 0)),
        ),
        compiler_params=pltpu.CompilerParams(
            dimension_semantics=("parallel",),       # megacore sharding on v7x
            vmem_limit_bytes=vmem_limit),
        cost_estimate=cost,
    )(loffset, z, w1, b1, w2, b2)


def _xavier_uniform(key, fan_in, fan_out, dtype=jnp.float32):
    # Matches torch.nn.init.xavier_uniform_ (gain=1): U(-a, a), a = sqrt(6/(fan_in+fan_out))
    a = math.sqrt(6.0 / (fan_in + fan_out))
    # stored as (in, out) = transpose of PyTorch's (out, in); distribution is symmetric
    return jax.random.uniform(key, (fan_in, fan_out), dtype=dtype, minval=-a, maxval=a)


def _linear_bias_default(key, fan_in, fan_out, dtype=jnp.float32):
    # PyTorch nn.Linear default bias init: U(-1/sqrt(fan_in), 1/sqrt(fan_in))
    bound = 1.0 / math.sqrt(fan_in)
    return jax.random.uniform(key, (1, fan_out), dtype=dtype, minval=-bound, maxval=bound)


if __name__ == "__main__":
    # Small, lane-dense feature dims; batch chosen so the grid has 2 steps and a
    # ragged last tile (exercises the masked-store path, no pad/slice in wrapper).
    dim, hidden_dim = 128, 256
    num_z, batch = 3, 200

    key = jax.random.PRNGKey(0)
    kl, kz, kw1, kb1, kw2, kb2 = jax.random.split(key, 6)

    loffset = jax.random.normal(kl, (batch, dim), dtype=jnp.float32)
    z = jax.random.normal(kz, (num_z, batch, dim), dtype=jnp.float32)
    w1 = _xavier_uniform(kw1, dim, hidden_dim)
    b1 = _linear_bias_default(kb1, dim, hidden_dim)
    w2 = _xavier_uniform(kw2, hidden_dim, dim)
    b2 = _linear_bias_default(kb2, hidden_dim, dim)

    out = nlk_difference_offset(loffset, z, w1, b1, w2, b2)
    jax.block_until_ready(out)

    # Plain-JAX f32 reference of the PyTorch forward.
    all_emb = jnp.concatenate([loffset[None, ...], z], axis=0)
    ref = jax.nn.softmax(jnp.maximum(all_emb @ w1 + b1, 0.0) @ w2 + b2, axis=0)

    assert out.shape == (num_z + 1, batch, dim)
    assert out.dtype == jnp.bfloat16
    # bf16 operands/output + approx reciprocal -> loose tolerance vs f32 reference.
    assert jnp.allclose(out.astype(jnp.float32), ref, atol=3e-2, rtol=3e-2)
    assert jnp.allclose(out.astype(jnp.float32).sum(axis=0), 1.0, atol=2e-2)

    print("KERNEL_OK")
</pallas_src>

<mosaic_0001>
module attributes {stable_mosaic.version = 11 : i64} {
  func.func @_nlk_kernel(%arg0: i32, %arg1: memref<112x128xf32, #tpu.memory_space<vmem>>, %arg2: memref<3x112x128xf32, #tpu.memory_space<vmem>>, %arg3: memref<128x256xbf16, #tpu.memory_space<vmem>>, %arg4: memref<1x256xf32, #tpu.memory_space<vmem>>, %arg5: memref<256x128xbf16, #tpu.memory_space<vmem>>, %arg6: memref<1x128xf32, #tpu.memory_space<vmem>>, %arg7: memref<4x112x128xbf16, #tpu.memory_space<vmem>>) attributes {dimension_semantics = [#tpu.dimension_semantics<parallel>], iteration_bounds = array<i64: 2>, scalar_prefetch = 0 : i64, scratch_operands = 0 : i64, tpu.core_type = #tpu.core_type<tc>, window_params = [{transform_indices = @transform_0, window_bounds = array<i64: 112, 128>}, {transform_indices = @transform_1, window_bounds = array<i64: 3, 112, 128>}, {pipeline_mode = #tpu.pipeline_mode<synchronous>, transform_indices = @transform_2, window_bounds = array<i64: 128, 256>}, {pipeline_mode = #tpu.pipeline_mode<synchronous>, transform_indices = @transform_3, window_bounds = array<i64: 1, 256>}, {pipeline_mode = #tpu.pipeline_mode<synchronous>, transform_indices = @transform_4, window_bounds = array<i64: 256, 128>}, {pipeline_mode = #tpu.pipeline_mode<synchronous>, transform_indices = @transform_5, window_bounds = array<i64: 1, 128>}, {transform_indices = @transform_6, window_bounds = array<i64: 4, 112, 128>}]} {
    %c0 = arith.constant 0 : index
    %c0_0 = arith.constant 0 : index
    %0 = vector.load %arg3[%c0, %c0_0] : memref<128x256xbf16, #tpu.memory_space<vmem>>, vector<128x256xbf16>
    %c0_1 = arith.constant 0 : index
    %c0_2 = arith.constant 0 : index
    %1 = vector.load %arg4[%c0_1, %c0_2] : memref<1x256xf32, #tpu.memory_space<vmem>>, vector<1x256xf32>
    %c0_3 = arith.constant 0 : index
    %c0_4 = arith.constant 0 : index
    %2 = vector.load %arg5[%c0_3, %c0_4] : memref<256x128xbf16, #tpu.memory_space<vmem>>, vector<256x128xbf16>
    %c0_5 = arith.constant 0 : index
    %c0_6 = arith.constant 0 : index
    %3 = vector.load %arg6[%c0_5, %c0_6] : memref<1x128xf32, #tpu.memory_space<vmem>>, vector<1x128xf32>
    %c0_7 = arith.constant 0 : index
    %c0_8 = arith.constant 0 : index
    %4 = vector.load %arg1[%c0_7, %c0_8] : memref<112x128xf32, #tpu.memory_space<vmem>>, vector<112x128xf32>
    %5 = arith.truncf %4 : vector<112x128xf32> to vector<112x128xbf16>
    %cst = arith.constant dense<0.000000e+00> : vector<112x256xf32>
    %6 = tpu.matmul %5, %0, %cst {dimension_numbers = #tpu.dot_dimension_numbers<[1], [0], [0], [1], [0, 0, 1, 1], [], []>} : vector<112x128xbf16>, vector<128x256xbf16>, vector<112x256xf32> -> vector<112x256xf32>
    %7 = vector.broadcast %1 : vector<1x256xf32> to vector<112x256xf32>
    %8 = arith.addf %6, %7 : vector<112x256xf32>
    %cst_9 = arith.constant 0.000000e+00 : f32
    %9 = vector.broadcast %cst_9 : f32 to vector<112x256xf32>
    %10 = arith.maximumf %8, %9 : vector<112x256xf32>
    %11 = arith.truncf %10 : vector<112x256xf32> to vector<112x256xbf16>
    %cst_10 = arith.constant dense<0.000000e+00> : vector<112x128xf32>
    %12 = tpu.matmul %11, %2, %cst_10 {dimension_numbers = #tpu.dot_dimension_numbers<[1], [0], [0], [1], [0, 0, 1, 1], [], []>} : vector<112x256xbf16>, vector<256x128xbf16>, vector<112x128xf32> -> vector<112x128xf32>
    %13 = vector.broadcast %3 : vector<1x128xf32> to vector<112x128xf32>
    %14 = arith.addf %12, %13 : vector<112x128xf32>
    %c0_11 = arith.constant 0 : index
    %c0_12 = arith.constant 0 : index
    %c0_13 = arith.constant 0 : index
    %15 = vector.load %arg2[%c0_11, %c0_12, %c0_13] : memref<3x112x128xf32, #tpu.memory_space<vmem>>, vector<3x112x128xf32>
    %16 = vector.shape_cast %15 : vector<3x112x128xf32> to vector<336x128xf32>
    %17 = arith.truncf %16 : vector<336x128xf32> to vector<336x128xbf16>
    %cst_14 = arith.constant dense<0.000000e+00> : vector<336x256xf32>
    %18 = tpu.matmul %17, %0, %cst_14 {dimension_numbers = #tpu.dot_dimension_numbers<[1], [0], [0], [1], [0, 0, 1, 1], [], []>} : vector<336x128xbf16>, vector<128x256xbf16>, vector<336x256xf32> -> vector<336x256xf32>
    %19 = vector.broadcast %1 : vector<1x256xf32> to vector<336x256xf32>
    %20 = arith.addf %18, %19 : vector<336x256xf32>
    %cst_15 = arith.constant 0.000000e+00 : f32
    %21 = vector.broadcast %cst_15 : f32 to vector<336x256xf32>
    %22 = arith.maximumf %20, %21 : vector<336x256xf32>
    %23 = arith.truncf %22 : vector<336x256xf32> to vector<336x256xbf16>
    %cst_16 = arith.constant dense<0.000000e+00> : vector<336x128xf32>
    %24 = tpu.matmul %23, %2, %cst_16 {dimension_numbers = #tpu.dot_dimension_numbers<[1], [0], [0], [1], [0, 0, 1, 1], [], []>} : vector<336x256xbf16>, vector<256x128xbf16>, vector<336x128xf32> -> vector<336x128xf32>
    %25 = vector.broadcast %3 : vector<1x128xf32> to vector<336x128xf32>
    %26 = arith.addf %24, %25 : vector<336x128xf32>
    %27 = vector.shape_cast %26 : vector<336x128xf32> to vector<3x112x128xf32>
    %cst_17 = arith.constant dense<0xFF800000> : vector<112x128xf32>
    %28 = vector.multi_reduction <maximumf>, %27, %cst_17 [0] : vector<3x112x128xf32> to vector<112x128xf32>
    %29 = arith.maximumf %14, %28 : vector<112x128xf32>
    %30 = arith.subf %14, %29 : vector<112x128xf32>
    %31 = math.exp %30 : vector<112x128xf32>
    %32 = vector.shape_cast %29 : vector<112x128xf32> to vector<1x112x128xf32>
    %33 = vector.broadcast %32 : vector<1x112x128xf32> to vector<3x112x128xf32>
    %34 = arith.subf %27, %33 : vector<3x112x128xf32>
    %35 = math.exp %34 : vector<3x112x128xf32>
    %cst_18 = arith.constant dense<0.000000e+00> : vector<112x128xf32>
    %36 = vector.multi_reduction <add>, %35, %cst_18 [0] : vector<3x112x128xf32> to vector<112x128xf32>
    %37 = arith.addf %31, %36 : vector<112x128xf32>
    %38 = tpu.reciprocal %37 {approx = true} : vector<112x128xf32> -> vector<112x128xf32>
    %39 = arith.mulf %31, %38 : vector<112x128xf32>
    %40 = arith.truncf %39 : vector<112x128xf32> to vector<112x128xbf16>
    %c0_19 = arith.constant 0 : index
    %c0_20 = arith.constant 0 : index
    %c0_21 = arith.constant 0 : index
    %41 = vector.load %arg7[%c0_19, %c0_20, %c0_21] : memref<4x112x128xbf16, #tpu.memory_space<vmem>>, vector<1x112x128xbf16>
    %42 = vector.shape_cast %41 : vector<1x112x128xbf16> to vector<112x128xbf16>
    %43 = vector.shape_cast %40 : vector<112x128xbf16> to vector<1x112x128xbf16>
    tpu.vector_store %arg7[%c0_19, %c0_20, %c0_21], %43 {strides = array<i32>} : memref<4x112x128xbf16, #tpu.memory_space<vmem>>, vector<1x112x128xbf16>,
    %44 = vector.shape_cast %38 : vector<112x128xf32> to vector<1x112x128xf32>
    %45 = vector.broadcast %44 : vector<1x112x128xf32> to vector<3x112x128xf32>
    %46 = arith.mulf %35, %45 : vector<3x112x128xf32>
    %47 = arith.truncf %46 : vector<3x112x128xf32> to vector<3x112x128xbf16>
    %c1 = arith.constant 1 : index
    %c0_22 = arith.constant 0 : index
    %c0_23 = arith.constant 0 : index
    %48 = vector.load %arg7[%c1, %c0_22, %c0_23] : memref<4x112x128xbf16, #tpu.memory_space<vmem>>, vector<3x112x128xbf16>
    tpu.vector_store %arg7[%c1, %c0_22, %c0_23], %47 {strides = array<i32>} : memref<4x112x128xbf16, #tpu.memory_space<vmem>>, vector<3x112x128xbf16>,
    return
  }
  func.func @transform_0(%arg0: i32) -> (i32, i32) {
    %c0_i32 = arith.constant 0 : i32
    %c0_i32_0 = arith.constant 0 : i32
    return %arg0, %c0_i32 : i32, i32
  }
  func.func @transform_1(%arg0: i32) -> (i32, i32, i32) {
    %c0_i32 = arith.constant 0 : i32
    %c0_i32_0 = arith.constant 0 : i32
    %c0_i32_1 = arith.constant 0 : i32
    return %c0_i32, %arg0, %c0_i32_0 : i32, i32, i32
  }
  func.func @transform_2(%arg0: i32) -> (i32, i32) {
    %c0_i32 = arith.constant 0 : i32
    %c0_i32_0 = arith.constant 0 : i32
    %c0_i32_1 = arith.constant 0 : i32
    return %c0_i32, %c0_i32_0 : i32, i32
  }
  func.func @transform_3(%arg0: i32) -> (i32, i32) {
    %c0_i32 = arith.constant 0 : i32
    %c0_i32_0 = arith.constant 0 : i32
    %c0_i32_1 = arith.constant 0 : i32
    return %c0_i32, %c0_i32_0 : i32, i32
  }
  func.func @transform_4(%arg0: i32) -> (i32, i32) {
    %c0_i32 = arith.constant 0 : i32
    %c0_i32_0 = arith.constant 0 : i32
    %c0_i32_1 = arith.constant 0 : i32
    return %c0_i32, %c0_i32_0 : i32, i32
  }
  func.func @transform_5(%arg0: i32) -> (i32, i32) {
    %c0_i32 = arith.constant 0 : i32
    %c0_i32_0 = arith.constant 0 : i32
    %c0_i32_1 = arith.constant 0 : i32
    return %c0_i32, %c0_i32_0 : i32, i32
  }
  func.func @transform_6(%arg0: i32) -> (i32, i32, i32) {
    %c0_i32 = arith.constant 0 : i32
    %c0_i32_0 = arith.constant 0 : i32
    %c0_i32_1 = arith.constant 0 : i32
    return %c0_i32, %arg0, %c0_i32_0 : i32, i32, i32
  }
}

</mosaic_0001>

<bundles_post_ra>
// kernel: tpu_custom_call.1
= control target key start
LH: loop header
LB: loop body
LE: loop exit
PB: predicated region body
PF: predicated region fallthrough
CT: control target
= control target key end

     0   :  { %s4273_s0 = inlined_call_operand.hbm [shape: f32[200,128], index: 0, kind: input, shape index: {}]   ;;  %s4274_s1 = inlined_call_operand.hbm [shape: f32[3,200,128], index: 1, kind: input, shape index: {}]   ;;  %s4275_s2 = inlined_call_operand.hbm [shape: bf16[128,256], index: 2, kind: input, shape index: {}]   ;;  %s4276_s3 = inlined_call_operand.vmem [shape: f32[1,256], index: 3, kind: input, shape index: {}]   ;;  %s4277_s4 = inlined_call_operand.hbm [shape: bf16[256,128], index: 4, kind: input, shape index: {}]   ;;  %s4278_s5 = inlined_call_operand.vmem [shape: f32[1,128], index: 5, kind: input, shape index: {}]   ;;  %s4279_s6 = inlined_call_operand.hbm [shape: bf16[4,200,128], index: 6, kind: output, shape index: {}]  }
   0x1   :  { %4285 = sst [smem:[#allocation22_spill]] %s4273_s0 }
   0x2   :  { %4286 = sst [smem:[#allocation23_spill]] %s4275_s2 }
   0x3   :  { %11 = vsyncpa [#allocation3], 0 }
   0x4   :  { %13 = vsyncpa [#allocation3 + $0x1], 0 }
   0x5   :  { %14 = vsyncpa [#allocation6], 0 }
   0x6   :  { %16 = vsyncpa [#allocation6 + $0x1], 0 }
   0x7   :  { %17 = vsyncpa [#allocation9], 0 }
   0x8   :  { %18 = vsyncpa [#allocation4], 0 }
   0x9   :  { %20 = vsyncpa [#allocation4 + $0x1], 0  ;;  %s3193_s21 = smov 0   ;;  %s3195_s22 = smov 0  }
   0xa   :  { %s3197_s23 = smov 0   ;;  %s3199_s24 = smov 0  }
   0xb LB: > { %s3214_s25 = sadd.s32 4294967295, %s3135_s24   ;;  %s2292_s26 = sadd.s32 4294967294, %s3135_s24   ;;  %s3135_s24 = sphi %s3199_s24, %s4317_s24   ;;  %s3131_s23 = sphi %s3197_s23, %s4321_s23   ;;  %s3127_s22 = sphi %s3195_s22, %s4320_s22   ;;  %s3123_s21 = sphi %s3193_s21, %s4319_s21  }
   0xc   : > { %s3218_s27 = sadd.s32 1, %s3135_s24   ;;  %s33_s28 = sadd.s32 1, %s3131_s23 }
   0xd   : > { %4287 = sst [smem:[#allocation20_spill]] %s3218_s27  ;;  %s30_s29 = ssub.s32 %s3135_s24, %s3218_s27 }
   0xe   : > { %p40_p0 = scmp.ne.s32.totalorder %s3131_s23, %s3127_s22  ;;  %p31_p1 = scmp.eq.s32.totalorder %s30_s29, 0 }
   0xf   : > { %p41_p2 = scmp.eq.s32.totalorder %s3135_s24, 0  ;;  %p46_p3 = scmp.ne.s32.totalorder %s3127_s22, %s3123_s21 }
  0x10   : > { %p4280_p4 = scmp.eq.s32.totalorder %s3214_s25, 0  ;;  %p180_p7 = scmp.eq.s32.totalorder %s3214_s25, 1 }
  0x11   : > { %s3230_s30 = scalar_select %p31_p1, %s3131_s23, %s33_s28  }
  0x12   : > { %p3232_p5 = por %p41_p2, %p40_p0  ;;  %p3238_p6 = por %p4280_p4, %p46_p3 }
  0x13   : > { %4288 = sst [smem:[#allocation21_spill]] %s3230_s30  ;;  %p186_p8 = scmp.eq.s32.totalorder %s2292_s26, 1 }
  0x14   : > { %s4289_s7 = scalar_select %p3232_p5, 1, 0 }
  0x15   : > { %s4290_s8 = scalar_select %p3238_p6, 1, 0 }
  0x16   : > { %p2293_p9 = scmp.ge.s32.totalorder %s3135_s24, 1  ;;  %p193_p10 = scmp.lt.s32.totalorder %s3135_s24, 3 }
  0x17   : > { %p3245_p11 = por %p180_p7, %p40_p0  ;;  %p3249_p12 = por %p186_p8, %p46_p3 }
  0x18   : > { %p3253_p13 = pnand %p2293_p9, %p193_p10  ;;  %s3137_s12 = smov [#allocation7]  }
  0x19   : > { %s4291_s9 = scalar_select %p3245_p11, 1, 0 }
  0x1a   : > { %s4292_s10 = scalar_select %p3249_p12, 1, 0 }
  0x1b   : > { %s4293_s11 = scalar_select %p3253_p13, 1, 0 }
  0x1c   : > { %p2753_p1 = pneg %p3253_p13  ;;  %s205_s13 = sshll.u32 %s3137_s12, 4  ;;  %s206_s13 = int_to_ptr.vmem [resolvable:$true] %s205_s13 }
  0x1d   : > { %s3138_s15 = smov [#allocation8]   ;;  %s4295_s2 = sld [smem:[#allocation23_spill]] }
  0x1e   : > { %p3261_p2 = pnand %p2753_p1, %p4280_p4  ;;  %s221_s16 = sshll.u32 %s3138_s15, 4  ;;  %s3265_s16 = int_to_ptr.vmem [resolvable:$true] %s221_s16 }
  0x20   : > { %p3003_p3 = pneg %p3261_p2 }
  0x23   : > { %s3001_s19 = scalar_lea.hbm %s4295_s2, 2048 }
  0x24   : > { %p3002_p0 = scmp.ne.s32.totalorder %s4295_s2, %s3001_s19  ;;  %p3008_p9 = scmp.lt.u32.totalorder %s3001_s19, %s4295_s2 }
  0x26   : > { %p3004_p7 = pnand %p3003_p3, %p3002_p0 }
  0x28   : > { %p3005_p8 = pneg %p3004_p7 }
  0x2a   : > { %p3010_p10 = pnand %p3008_p9, %p3005_p8 }
  0x2c   : > { %3013 = shalt.err (!%p3010_p10)
}
  0x2d   : > { %s3014_s12 = scalar_lea.vmem %s206_s13, 2048  ;;  %p3022_p11 = scmp.lt.s32.totalorder %s206_s13, %s206_s13 }
  0x2e   : > { %p3015_p1 = scmp.ne.s32.totalorder %s206_s13, %s3014_s12  ;;  %p3023_p6 = scmp.lt.s32.totalorder %s3014_s12, %s3014_s12 }
  0x30   : > { %p3017_p4 = pnand %p3015_p1, %p3003_p3  ;;  %p3024_p13 = por %p3023_p6, %p3022_p11 }
  0x32   : > { %p3018_p12 = pneg %p3017_p4 }
  0x34   : > { %p3025_p5 = pnand %p3024_p13, %p3018_p12 }
  0x36   : > { %3028 = shalt.err (!%p3025_p5)
}
  0x37   : > { %s3139_s15 = smov 128   ;;  %s3140_s17 = smov 8  }
  0x38   : > { %2756 = dma.hbm_to_vmem [thread:$0]  (!%p3261_p2), %s4295_s2, 2048, %s206_s13, [#allocation6], %s3139_s15, %s3139_s15, %s3140_s17  }
  0x39   : > { %s3029_s28 = scalar_lea.hbm %s4277_s4, 2048 }
  0x3a   : > { %p3030_p4 = scmp.ne.s32.totalorder %s4277_s4, %s3029_s28  ;;  %p3036_p11 = scmp.lt.u32.totalorder %s3029_s28, %s4277_s4 }
  0x3c   : > { %p3032_p5 = pnand %p3030_p4, %p3003_p3 }
  0x3e   : > { %p3033_p6 = pneg %p3032_p5 }
  0x40   : > { %p3038_p12 = pnand %p3036_p11, %p3033_p6 }
  0x42   : > { %3041 = shalt.err (!%p3038_p12)
}
  0x43   : > { %s3042_s13 = scalar_lea.vmem %s3265_s16, 2048  ;;  %p3050_p8 = scmp.lt.s32.totalorder %s3265_s16, %s3265_s16 }
  0x44   : > { %p3043_p13 = scmp.ne.s32.totalorder %s3265_s16, %s3042_s13  ;;  %p3051_p9 = scmp.lt.s32.totalorder %s3042_s13, %s3042_s13 }
  0x46   : > { %p3045_p0 = pnand %p3043_p13, %p3003_p3  ;;  %p3052_p10 = por %p3051_p9, %p3050_p8 }
  0x48   : > { %p3046_p7 = pneg %p3045_p0 }
  0x4a   : > { %p3053_p1 = pnand %p3052_p10, %p3046_p7 }
  0x4c   : > { %3056 = shalt.err (!%p3053_p1)
}
  0x4d   : > { %s3141_s27 = smov 64   ;;  %s3142_s30 = smov 4  }
  0x4e   : > { %2759 = dma.hbm_to_vmem [thread:$0]  (!%p3261_p2), %s4277_s4, 2048, %s3265_s16, [#allocation9], %s3141_s27, %s3141_s27, %s3142_s30  }
  0x4f   : > { %p2296_p4 = scmp.ge.s32.totalorder %s3135_s24, 2 }
  0x50   : > { %p4296_p3 = scmp.ne.s32.totalorder (!%p2296_p4), %s4289_s7, 0 }
  0x51   : > { %234 = sbr.rel (%p2296_p4) target bundleno = 158 (0x9e), region = 32 }
  0x58   : > { %237 = sbr.rel (!%p4296_p3) target bundleno = 128 (0x80), region = 36  ;;  %s238_s18 = sand.u32 (%p4296_p3), 1, %s3131_s23  }
  0x59   : > { %s243_s19 = smul.u32 (%p4296_p3), 14, %s3135_s24  ;;  %s3324_s28 = scalar_lea.sflag (%p4296_p3), [#allocation3], %s238_s18 }
  0x5a   : > { %s2737_s20 = smul.u32 (%p4296_p3), 112, %s238_s18 }
  0x5b   : > { %s244_s26 = ssub.s32 (%p4296_p3), 25, %s243_s19 }
  0x5c   : > { %p245_p5 = scmp.lt.s32.totalorder (%p4296_p3), %s244_s26, 14  ;;  %s242_s29 = scalar_lea.vmem (%p4296_p3), [#allocation2], %s2737_s20 }
  0x5f   : > { %s4323_s26 = smov (!%p245_p5, %s244_s26), 14 }
  0x60   : > { %s3321_s14 = sshll.u32 %s4323_s26, 7 }
  0x61   : > { %s249_s16 = ssub.s32 1792, %s3321_s14 }
  0x62   : > { %250 = vsyncadd %s3324_s28, %s249_s16  ;;  %p2298_p2 = scmp.ne.s32.totalorder %s3321_s14, 0  ;;  %s2451_s12 = smul.u32 1792, %s3135_s24 }
  0x63   : > { %s255_s13 = sshll.u32 %s242_s29, 4  ;;  %s4297_s0 = sld [smem:[#allocation22_spill]]  ;;  %s3334_s13 = int_to_ptr.vmem [resolvable:$true] %s255_s13 }
  0x69   : > { %s3332_s15 = scalar_lea.hbm %s4297_s0, %s2451_s12  ;;  %s3061_s20 = scalar_lea.hbm %s4297_s0, 3200 }
  0x6a   : > { %s3057_s17 = scalar_lea.hbm %s3332_s15, %s3321_s14  ;;  %p3062_p13 = scmp.lt.u32.totalorder %s3332_s15, %s4297_s0 }
  0x6b   : > { %p3058_p6 = scmp.ne.s32.totalorder %s3332_s15, %s3057_s17  ;;  %p3063_p0 = scmp.lt.u32.totalorder %s3061_s20, %s3057_s17 }
  0x6c   : > { %p3065_p8 = scmp.lt.u32.totalorder %s3057_s17, %s3332_s15 }
  0x6d   : > { %p3059_p11 = pnand %p3058_p6, %p2298_p2  ;;  %p3064_p7 = por %p3063_p0, %p3062_p13 }
  0x6f   : > { %p3060_p12 = pneg %p3059_p11  ;;  %p3066_p9 = por %p3065_p8, %p3064_p7 }
  0x71   : > { %p3067_p10 = pnand %p3066_p9, %p3060_p12 }
  0x73   : > { %3070 = shalt.err (!%p3067_p10)
}
  0x74   : > { %s3071_s29 = scalar_lea.vmem %s3334_s13, %s3321_s14  ;;  %s3143_s12 = smov [#allocation2]  }
  0x75   : > { %p3072_p1 = scmp.ne.s32.totalorder %s3334_s13, %s3071_s29  ;;  %s3075_s27 = sshll.u32 %s3143_s12, 4  ;;  %s3076_s27 = int_to_ptr.vmem [resolvable:$false] %s3075_s27 }
  0x76   : > { %s3077_s30 = scalar_lea.vmem %s3076_s27, 3584  ;;  %p3078_p6 = scmp.lt.s32.totalorder %s3334_s13, %s3076_s27 }
  0x77   : > { %p3073_p3 = pnand %p3072_p1, %p2298_p2  ;;  %p3079_p11 = scmp.lt.s32.totalorder %s3077_s30, %s3071_s29 }
  0x79   : > { %p3074_p5 = pneg %p3073_p3  ;;  %p3080_p13 = por %p3079_p11, %p3078_p6 }
  0x7b   : > { %p3081_p0 = pnand %p3080_p13, %p3074_p5 }
  0x7d   : > { %3084 = shalt.err (!%p3081_p0)
}
  0x7e   : > { %s3144_s17 = smov 128   ;;  %s3145_s18 = smov 8  }
  0x7f   : > { %261 = dma.hbm_to_vmem [thread:$0]  (%p2298_p2), %s3332_s15, %s3321_s14, %s3334_s13, %s3324_s28, %s3144_s17, %s3144_s17, %s3145_s18  }
  0x80 PF: > { %p4298_p12 = scmp.ne.s32.totalorder %s4289_s7, 0 }
  0x82   : > { %264 = sbr.rel (!%p4298_p12) target bundleno = 158 (0x9e), region = 40 }
  0x89   : > { %s265_s19 = sand.u32 1, %s3135_s24   ;;  %s267_s20 = sand.u32 1, %s3131_s23  }
  0x8a   : > { %s2738_s26 = smul.u32 336, %s267_s20  ;;  %s266_s30 = scalar_lea.sflag [#allocation6], %s265_s19 }
  0x8b   : > { %s270_s16 = smul.u32 14, %s3135_s24 }
  0x8c   : > { %s269_s0 = scalar_lea.vmem [#allocation5], %s2738_s26 }
  0x8d   : > { %s271_s29 = ssub.s32 25, %s270_s16 }
  0x8e   : > { %p272_p7 = scmp.lt.s32.totalorder %s271_s29, 14 }
  0x90   : > { %s4325_s29 = smov (!%p272_p7, %s271_s29), 14 }
  0x91   : > { %s274_s12 = smul.u32 384, %s4325_s29 }
  0x93   : > { %s276_s27 = ssub.s32 5376, %s274_s12 }
  0x94   : > { %277 = vsyncadd %s266_s30, %s276_s27  ;;  %p2302_p2 = scmp.ne.s32.totalorder %s274_s12, 0  ;;  %s2452_s14 = smul.u32 1792, %s3135_s24 }
  0x95   : > { %s287_s7 = sld [smem:[#allocation0]]   ;;  %s295_s28 = sshll.u32 %s269_s0, 4  ;;  %s296_s28 = int_to_ptr.vmem [resolvable:$true] %s295_s28 }
  0x96   : > { %s280_s17 = scalar_lea.hbm %s4274_s1, %s2452_s14  ;;  %s3146_s18 = smov 3200  }
  0x97   : > { %302 = sst [smem:[#allocation12]] %s3146_s18  ;;  %s3147_s20 = smov 1792  }
  0x98   : > { %304 = sst [smem:[#allocation12 + $0x1]] %s3147_s20  ;;  %s3148_s2 = smov 128  }
  0x99   : > { %306 = sst [smem:[#allocation12 + $0x2]] %s4325_s29  ;;  %s3149_s26 = smov 8  }
  0x9a   : > { %308 = sst [smem:[#allocation12 + $0x3]] %s3148_s2  ;;  %s3150_s27 = smov [#allocation11]  }
  0x9b   : > { %s2306_s16 = sshll.u32 %s287_s7, 26  ;;  %310 = sst [smem:[#allocation12 + $0x4]] %s3148_s2 }
  0x9c   : > { %s2307_s19 = sadd.s32 134217728, %s2306_s16  ;;  %312 = sst [smem:[#allocation12 + $0x5]] %s3149_s26 }
  0x9d   : > { %314 = dma.general (%p2302_p2), %s280_s17, %s274_s12, %s296_s28, %s266_s30, %s3150_s27, [#allocation12], %s2307_s19, 0  }
  0x9e PF: > { %p4299_p8 = scmp.ne.s32.totalorder %s4293_s11, 0 }
  0x9f   : > { %s3374_s0 = sand.u32 (!%p4299_p8), 1, %s3127_s22   ;;  %p4300_p9 = scmp.ne.s32.totalorder (!%p4299_p8), %s4290_s8, 0 }
  0xa0   : > { %320 = sbr.rel (%p4299_p8) target bundleno = 965 (0x3c5), region = 44  ;;  %s323_s14 = scalar_lea.sflag (!%p4299_p8), [#allocation3], %s3374_s0 }
  0xa1   : > { %s2739_s29 = smul.u32 (!%p4299_p8), 112, %s3374_s0 }
  0xa3   : > { %s3378_s7 = scalar_lea.vmem (!%p4299_p8), [#allocation2], %s2739_s29 }
  0xa7   : > { %3102 = dma.done.wait (%p4300_p9), %s323_s14, 1792  }
  0xa8   : > { %3104 = vsyncadd (%p4300_p9), %s323_s14, 4294965504  ;;  %s331_s2 = sand.u32 1, %s3214_s25   ;;  %s2740_s11 = smul.u32 336, %s3374_s0 }
  0xa9   : > { %s332_s12 = scalar_lea.sflag [#allocation6], %s331_s2 }
  0xaa   : > { %s3386_s30 = scalar_lea.vmem [#allocation5], %s2740_s11 }
  0xab   : > { %3106 = dma.done.wait (%p4300_p9), %s332_s12, 5376  }
  0xac   : > { %3108 = vsyncadd (%p4300_p9), %s332_s12, 4294961920  ;;  %p4301_p10 = scmp.eq.s32.totalorder %s3214_s25, 0 }
  0xae   : > { %3110 = dma.done.wait (%p4301_p10), [#allocation6], 2048   ;;  %p4302_p1 = pmov %p4301_p10 }
  0xb0   : > { %3112 = vsyncadd (%p4302_p1), [#allocation6], 4294965248  ;;  %p4303_p3 = pmov %p4302_p1 }
  0xb1   : > { %p4304_p5 = pmov %p4302_p1 }
  0xb2   : > { %3114 = dma.done.wait (%p4303_p3), [#allocation9], 2048  }
  0xb3   : > { %3116 = vsyncadd (%p4304_p5), [#allocation9], 4294965248  ;;  %v3151_v0 = vmov 0   ;;  %v2821_v1 = vld [vmem:[#allocation7 + $0x4] ss:$8 sps:$4 sm:$0xff]   ;;  %v3439_v48 = vld [vmem:[#allocation8 + $0x50] sm:$0xff]  }
  0xb4   : > { %587 = vmatprep.mubr.bf16.mxu0 %v3151_v0  ;;  %v2823_v2 = vld [vmem:[#allocation7] ss:$8 sps:$4 sm:$0xff]   ;;  %555 = vmatprep.subr.bf16.mxu0 %v2821_v1  ;;  %v2824_v3 = vld [vmem:[#allocation7 + $0x14] ss:$8 sps:$4 sm:$0xff]   ;;  %v2826_v4 = vld [vmem:[#allocation7 + $0x10] ss:$8 sps:$4 sm:$0xff]  }
  0xb5   : > { %556 = vmatpush1.bf16.msra.mxu0 %v2823_v2  ;;  %v2827_v5 = vld [vmem:[#allocation7 + $0x24] ss:$8 sps:$4 sm:$0xff]   ;;  %v2829_v6 = vld [vmem:[#allocation7 + $0x20] ss:$8 sps:$4 sm:$0xff]   ;;  %v2830_v7 = vld [vmem:[#allocation7 + $0x34] ss:$8 sps:$4 sm:$0xff]  }
  0xb6   : > { %557 = vmatprep.subr.bf16.mxu0 %v2824_v3  ;;  %v2832_v8 = vld [vmem:[#allocation7 + $0x30] ss:$8 sps:$4 sm:$0xff]   ;;  %v2833_v9 = vld [vmem:[#allocation7 + $0x44] ss:$8 sps:$4 sm:$0xff]   ;;  %v2835_v10 = vld [vmem:[#allocation7 + $0x40] ss:$8 sps:$4 sm:$0xff]  }
  0xb7   : > { %v2836_v11 = vld [vmem:[#allocation7 + $0x54] ss:$8 sps:$4 sm:$0xff]   ;;  %v2838_v12 = vld [vmem:[#allocation7 + $0x50] ss:$8 sps:$4 sm:$0xff]   ;;  %v2839_v13 = vld [vmem:[#allocation7 + $0x64] ss:$8 sps:$4 sm:$0xff]  }
  0xb8   : > { %v2841_v14 = vld [vmem:[#allocation7 + $0x60] ss:$8 sps:$4 sm:$0xff]   ;;  %v2842_v15 = vld [vmem:[#allocation7 + $0x74] ss:$8 sps:$4 sm:$0xff]   ;;  %v2844_v16 = vld [vmem:[#allocation7 + $0x70] ss:$8 sps:$4 sm:$0xff]  }
  0xb9   : > { %558 = vmatpush1.bf16.msra.mxu0 %v2826_v4  ;;  %v443_v17 = vld [vmem:[%s3378_s7] sm:$0xff]  ;;  %v444_v18 = vld [vmem:[%s3378_s7 + $0x8] sm:$0xff]  ;;  %v445_v20 = vld [vmem:[%s3378_s7 + $0x10] sm:$0xff]  ;;  %s2741_s17 = smul.u32 224, %s3374_s0  ;;  %s2128_s20 = scalar_lea.sflag [#allocation4], %s3374_s0 }
  0xba   : > { %559 = vmatprep.subr.bf16.mxu0 %v2827_v5  ;;  %v457_v19 = vpack.c.bf16 %v444_v18, %v443_v17  ;;  %v446_v21 = vld [vmem:[%s3378_s7 + $0x18] sm:$0xff]  ;;  %v447_v23 = vld [vmem:[%s3378_s7 + $0x20] sm:$0xff]  ;;  %v448_v24 = vld [vmem:[%s3378_s7 + $0x28] sm:$0xff]  ;;  %p4315_p6 = scmp.ne.s32.totalorder %s4291_s9, 0 }
  0xbb   : > { %v458_v22 = vpack.c.bf16 %v446_v21, %v445_v20  ;;  %v459_v25 = vpack.c.bf16 %v448_v24, %v447_v23  ;;  %v449_v26 = vld [vmem:[%s3378_s7 + $0x30] sm:$0xff]  ;;  %v450_v27 = vld [vmem:[%s3378_s7 + $0x38] sm:$0xff]  ;;  %v451_v29 = vld [vmem:[%s3378_s7 + $0x40] sm:$0xff]  ;;  %s4034_s18 = scalar_lea.vmem [#allocation10], %s2741_s17 }
  0xbc   : > { %v460_v28 = vpack.c.bf16 %v450_v27, %v449_v26  ;;  %v452_v30 = vld [vmem:[%s3378_s7 + $0x48] sm:$0xff]  ;;  %v453_v32 = vld [vmem:[%s3378_s7 + $0x50] sm:$0xff]  ;;  %v454_v33 = vld [vmem:[%s3378_s7 + $0x58] sm:$0xff] }
  0xbd   : > { %560 = vmatpush1.bf16.msra.mxu0 %v2829_v6  ;;  %v461_v31 = vpack.c.bf16 %v452_v30, %v451_v29  ;;  %v462_v34 = vpack.c.bf16 %v454_v33, %v453_v32  ;;  %v455_v35 = vld [vmem:[%s3378_s7 + $0x60] sm:$0xff]  ;;  %v456_v36 = vld [vmem:[%s3378_s7 + $0x68] sm:$0xff]  ;;  %v893_v44 = vld [vmem:[%s3386_s30 + $0x10] sm:$0xff] }
  0xbe   : > { %561 = vmatprep.subr.bf16.mxu0 %v2830_v7  ;;  %v463_v37 = vpack.c.bf16 %v456_v36, %v455_v35  ;;  %v891_v38 = vld [vmem:[%s3386_s30] sm:$0xff]  ;;  %v892_v39 = vld [vmem:[%s3386_s30 + $0x8] sm:$0xff]  ;;  %v894_v45 = vld [vmem:[%s3386_s30 + $0x18] sm:$0xff] }
  0xbf   : > { %v933_v40 = vpack.c.bf16 %v892_v39, %v891_v38  ;;  %v3424_v41 = vld [vmem:[#allocation8 + $0x40] sm:$0xff]   ;;  %v3428_v43 = vld [vmem:[#allocation8 + $0x48] sm:$0xff]   ;;  %v934_v47 = vpack.c.bf16 %v894_v45, %v893_v44  ;;  %v3441_v49 = vld [vmem:[#allocation8 + $0x10] sm:$0xff]  }
  0xc0   : > { %v3426_v42 = vld [vmem:[#allocation8] sm:$0xff]   ;;  %2679 = vmatprep.subr.bf16.mxu1 %v3424_v41  ;;  %v3435_v46 = vld [vmem:[#allocation8 + $0x8] sm:$0xff]   ;;  %v3443_v50 = vld [vmem:[#allocation8 + $0x58] sm:$0xff]  }
  0xc1   : > { %562 = vmatpush1.bf16.msra.mxu0 %v2832_v8  ;;  %2680 = vmatpush3.bf16.msra.mxu1 %v3426_v42  ;;  %v895_v51 = vld [vmem:[%s3386_s30 + $0x20] sm:$0xff]  ;;  %v896_v52 = vld [vmem:[%s3386_s30 + $0x28] sm:$0xff]  ;;  %v897_v58 = vld [vmem:[%s3386_s30 + $0x30] sm:$0xff] }
  0xc2   : > { %563 = vmatprep.subr.bf16.mxu0 %v2833_v9  ;;  %2681 = vmatprep.subr.bf16.mxu1 %v3428_v43  ;;  %v3450_v53 = vld [vmem:[#allocation8 + $0x18] sm:$0xff]   ;;  %v935_v54 = vpack.c.bf16 %v896_v52, %v895_v51  ;;  %v3454_v55 = vld [vmem:[#allocation8 + $0x60] sm:$0xff]   ;;  %v3458_v57 = vld [vmem:[#allocation8 + $0x68] sm:$0xff]  }
  0xc3   : > { %v3456_v56 = vld [vmem:[#allocation8 + $0x20] sm:$0xff]   ;;  %v898_v59 = vld [vmem:[%s3386_s30 + $0x38] sm:$0xff]  ;;  %v900_v63 = vld [vmem:[%s3386_s30 + $0x48] sm:$0xff] }
  0xc4   : > { %v3465_v60 = vld [vmem:[#allocation8 + $0x28] sm:$0xff]   ;;  %v936_v61 = vpack.c.bf16 %v898_v59, %v897_v58  ;;  %v899_v62 = vld [vmem:[%s3386_s30 + $0x40] sm:$0xff]  ;;  %v909_v18 = vld [vmem:[%s3386_s30 + $0x90] sm:$0xff]  ;;  %v465_v59 = vlaneseq }
  0xc5   : > { %564 = vmatpush1.bf16.msra.mxu0 %v2835_v10  ;;  %2682 = vmatpush3.bf16.msra.mxu1 %v3435_v46  ;;  %v911_v21 = vld [vmem:[%s3386_s30 + $0xa0] sm:$0xff]  ;;  %v913_v24 = vld [vmem:[%s3386_s30 + $0xb0] sm:$0xff] }
  0xc6   : > { %565 = vmatprep.subr.bf16.mxu0 %v2836_v11  ;;  %2683 = vmatprep.subr.bf16.mxu1 %v3439_v48  ;;  %v915_v27 = vld [vmem:[%s3386_s30 + $0xc0] sm:$0xff]  ;;  %v917_v30 = vld [vmem:[%s3386_s30 + $0xd0] sm:$0xff] }
  0xc7   : > { %v919_v33 = vld [vmem:[%s3386_s30 + $0xe0] sm:$0xff]  ;;  %v921_v36 = vld [vmem:[%s3386_s30 + $0xf0] sm:$0xff] }
  0xc8   : > { %v923_v39 = vld [vmem:[%s3386_s30 + $0x100] sm:$0xff]  ;;  %v925_v45 = vld [vmem:[%s3386_s30 + $0x110] sm:$0xff] }
  0xc9   : > { %566 = vmatpush1.bf16.msra.mxu0 %v2838_v12  ;;  %2684 = vmatpush3.bf16.msra.mxu1 %v3441_v49  ;;  %v927_v52 = vld [vmem:[%s3386_s30 + $0x120] sm:$0xff] }
  0xca   : > { %567 = vmatprep.subr.bf16.mxu0 %v2839_v13  ;;  %2685 = vmatprep.subr.bf16.mxu1 %v3443_v50 }
  0xcd   : > { %568 = vmatpush1.bf16.msra.mxu0 %v2841_v14  ;;  %2686 = vmatpush3.bf16.msra.mxu1 %v3450_v53 }
  0xce   : > { %569 = vmatprep.subr.bf16.mxu0 %v2842_v15  ;;  %2687 = vmatprep.subr.bf16.mxu1 %v3454_v55 }
  0xd1   : > { %570 = vmatpush1.bf16.msra.mxu0 %v2844_v16  ;;  %2688 = vmatpush3.bf16.msra.mxu1 %v3456_v56 }
  0xd2   : > { %954 = vmatprep.subr.bf16.mxu0 %v2821_v1  ;;  %2689 = vmatprep.subr.bf16.mxu1 %v3458_v57  ;;  %v3472_v1 = vld [vmem:[#allocation8 + $0x70] sm:$0xff]  }
  0xd4   : > { %588 = vmatmul.mubr.bf16.vlgmr.msra.gmra.mrb[0].mxu0 %v457_v19  ;;  %v910_v19 = vld [vmem:[%s3386_s30 + $0x98] sm:$0xff] }
  0xd5   : > { %597 = vmatprep.mubr.bf16.mxu0 %v3151_v0  ;;  %955 = vmatpush1.bf16.msra.mxu0 %v2823_v2  ;;  %v937_v2 = vpack.c.bf16 %v900_v63, %v899_v62  ;;  %v942_v20 = vpack.c.bf16 %v910_v19, %v909_v18  ;;  %v929_v62 = vld [vmem:[%s3386_s30 + $0x130] sm:$0xff]  ;;  %v930_v63 = vld [vmem:[%s3386_s30 + $0x138] sm:$0xff] }
  0xd6   : > { %956 = vmatprep.subr.bf16.mxu0 %v2824_v3  ;;  %2690 = vmatpush3.bf16.msra.mxu1 %v3465_v60  ;;  %v3474_v3 = vld [vmem:[#allocation8 + $0x30] sm:$0xff]  }
  0xd7   : > { %2691 = vmatprep.subr.bf16.mxu1 %v3472_v1 }
  0xd9   : > { %957 = vmatpush1.bf16.msra.mxu0 %v2826_v4  ;;  %v3478_v4 = vld [vmem:[#allocation8 + $0x78] sm:$0xff]  }
  0xda   : > { %958 = vmatprep.subr.bf16.mxu0 %v2827_v5  ;;  %2692 = vmatpush3.bf16.msra.mxu1 %v3474_v3  ;;  %v3480_v5 = vld [vmem:[#allocation8 + $0x38] sm:$0xff]  }
  0xdb   : > { %2693 = vmatprep.subr.bf16.mxu1 %v3478_v4 }
  0xdc   : > { %598 = vmatmul.mubr.bf16.gmra.mrb[4].mxu0 %v458_v22  ;;  %v912_v22 = vld [vmem:[%s3386_s30 + $0xa8] sm:$0xff] }
  0xdd   : > { %607 = vmatprep.mubr.bf16.mxu0 %v3151_v0  ;;  %959 = vmatpush1.bf16.msra.mxu0 %v2829_v6  ;;  %v901_v6 = vld [vmem:[%s3386_s30 + $0x50] sm:$0xff]  ;;  %v943_v23 = vpack.c.bf16 %v912_v22, %v911_v21 }
  0xde   : > { %960 = vmatprep.subr.bf16.mxu0 %v2830_v7  ;;  %v902_v7 = vld [vmem:[%s3386_s30 + $0x58] sm:$0xff]  ;;  %2694 = vmatpush3.bf16.msra.mxu1 %v3480_v5 }
  0xdf   : > { %1323 = vmatprep.subr.bf16.mxu1 %v3151_v0 }
  0xe1   : > { %961 = vmatpush1.bf16.msra.mxu0 %v2832_v8  ;;  %v938_v8 = vpack.c.bf16 %v902_v7, %v901_v6  ;;  %v952_v6 = vpack.c.bf16 %v930_v63, %v929_v62  ;;  %v409_v7 = vld [vmem:[%s4276_s3] sm:$0x3] }
  0xe2   : > { %962 = vmatprep.subr.bf16.mxu0 %v2833_v9  ;;  %v903_v9 = vld [vmem:[%s3386_s30 + $0x60] sm:$0xff] }
  0xe4   : > { %608 = vmatmul.mubr.bf16.gmra.mrb[8].mxu0 %v459_v25  ;;  %v914_v25 = vld [vmem:[%s3386_s30 + $0xb8] sm:$0xff] }
  0xe5   : > { %617 = vmatprep.mubr.bf16.mxu0 %v3151_v0  ;;  %963 = vmatpush1.bf16.msra.mxu0 %v2835_v10  ;;  %v904_v10 = vld [vmem:[%s3386_s30 + $0x68] sm:$0xff]  ;;  %v944_v26 = vpack.c.bf16 %v914_v25, %v913_v24 }
  0xe6   : > { %964 = vmatprep.subr.bf16.mxu0 %v2836_v11  ;;  %v939_v11 = vpack.c.bf16 %v904_v10, %v903_v9 }
  0xe9   : > { %965 = vmatpush1.bf16.msra.mxu0 %v2838_v12  ;;  %v905_v12 = vld [vmem:[%s3386_s30 + $0x70] sm:$0xff] }
  0xea   : > { %966 = vmatprep.subr.bf16.mxu0 %v2839_v13  ;;  %v906_v13 = vld [vmem:[%s3386_s30 + $0x78] sm:$0xff] }
  0xec   : > { %618 = vmatmul.mubr.bf16.gmra.mrb[12].mxu0 %v460_v28  ;;  %v916_v28 = vld [vmem:[%s3386_s30 + $0xc8] sm:$0xff] }
  0xed   : > { %627 = vmatprep.mubr.bf16.mxu0 %v3151_v0  ;;  %967 = vmatpush1.bf16.msra.mxu0 %v2841_v14  ;;  %v940_v14 = vpack.c.bf16 %v906_v13, %v905_v12  ;;  %v945_v29 = vpack.c.bf16 %v916_v28, %v915_v27  ;;  %v932_v12 = vld [vmem:[%s3386_s30 + $0x148] sm:$0xff] }
  0xee   : > { %968 = vmatprep.subr.bf16.mxu0 %v2842_v15  ;;  %v907_v15 = vld [vmem:[%s3386_s30 + $0x80] sm:$0xff] }
  0xf1   : > { %969 = vmatpush1.bf16.msra.mxu0 %v2844_v16  ;;  %v908_v16 = vld [vmem:[%s3386_s30 + $0x88] sm:$0xff] }
  0xf2   : > { %v941_v17 = vpack.c.bf16 %v908_v16, %v907_v15 }
  0xf4   : > { %628 = vmatmul.mubr.bf16.gmra.mrb[16].mxu0 %v461_v31  ;;  %v918_v31 = vld [vmem:[%s3386_s30 + $0xd8] sm:$0xff] }
  0xf5   : > { %637 = vmatprep.mubr.bf16.mxu0 %v3151_v0  ;;  %v946_v32 = vpack.c.bf16 %v918_v31, %v917_v30 }
  0xfc   : > { %638 = vmatmul.mubr.bf16.gmra.mrb[20].mxu0 %v462_v34  ;;  %v920_v34 = vld [vmem:[%s3386_s30 + $0xe8] sm:$0xff] }
  0xfd   : > { %647 = vmatprep.mubr.bf16.mxu0 %v3151_v0  ;;  %v947_v35 = vpack.c.bf16 %v920_v34, %v919_v33 }
 0x104   : > { %648 = vmatmul.mubr.bf16.gmra.mrb[24].mxu0 %v463_v37  ;;  %v922_v37 = vld [vmem:[%s3386_s30 + $0xf8] sm:$0xff] }
 0x105   : > { %986 = vmatprep.mubr.bf16.mxu0 %v3151_v0  ;;  %v948_v38 = vpack.c.bf16 %v922_v37, %v921_v36 }
 0x10c   : > { %987 = vmatmul.mubr.bf16.vlgmr.msra.gmra.mrb[28].mxu0 %v933_v40  ;;  %v924_v40 = vld [vmem:[%s3386_s30 + $0x108] sm:$0xff] }
 0x10d   : > { %996 = vmatprep.mubr.bf16.mxu0 %v3151_v0  ;;  %v949_v44 = vpack.c.bf16 %v924_v40, %v923_v39 }
 0x114   : > { %997 = vmatmul.mubr.bf16.gmra.mrb[32].mxu0 %v934_v47  ;;  %v926_v47 = vld [vmem:[%s3386_s30 + $0x118] sm:$0xff] }
 0x115   : > { %1006 = vmatprep.mubr.bf16.mxu0 %v3151_v0  ;;  %v950_v51 = vpack.c.bf16 %v926_v47, %v925_v45 }
 0x11c   : > { %1007 = vmatmul.mubr.bf16.gmra.mrb[36].mxu0 %v935_v54  ;;  %v928_v54 = vld [vmem:[%s3386_s30 + $0x128] sm:$0xff] }
 0x11d   : > { %1016 = vmatprep.mubr.bf16.mxu0 %v3151_v0  ;;  %v951_v58 = vpack.c.bf16 %v928_v54, %v927_v52 }
 0x124   : > { %1017 = vmatmul.mubr.bf16.gmra.mrb[40].mxu0 %v936_v61  ;;  %v466_v61 = vshrl.u32 %v465_v59, 7 }
 0x125   : > { %1026 = vmatprep.mubr.bf16.mxu0 %v3151_v0 }
 0x12c   : > { %1027 = vmatmul.mubr.bf16.gmra.mrb[44].mxu0 %v937_v2  ;;  %v467_v2 = vsub.s32 0, %v466_v61 }
 0x12d   : > { %1036 = vmatprep.mubr.bf16.mxu0 %v3151_v0 }
 0x12e   : > { %v3533_v9 = vrot.slane %v409_v7, %v467_v2 }
 0x134   : > { %1037 = vmatmul.mubr.bf16.gmra.mrb[48].mxu0 %v938_v8  ;;  %v471_v8 = vsub.s32 1, %v466_v61 }
 0x135   : > { %1046 = vmatprep.mubr.bf16.mxu0 %v3151_v0 }
 0x136   : > { %v3535_v10 = vrot.slane %v409_v7, %v471_v8 }
 0x13c   : > { %1047 = vmatmul.mubr.bf16.gmra.mrb[52].mxu0 %v939_v11  ;;  %v931_v11 = vld [vmem:[%s3386_s30 + $0x140] sm:$0xff] }
 0x13d   : > { %1056 = vmatprep.mubr.bf16.mxu0 %v3151_v0  ;;  %v953_v16 = vpack.c.bf16 %v932_v12, %v931_v11 }
 0x144   : > { %1057 = vmatmul.mubr.bf16.gmra.mrb[56].mxu0 %v940_v14 }
 0x145   : > { %1066 = vmatprep.mubr.bf16.mxu0 %v3151_v0 }
 0x14c   : > { %1067 = vmatmul.mubr.bf16.gmra.mrb[60].mxu0 %v941_v17 }
 0x14d   : > { %1076 = vmatprep.mubr.bf16.mxu0 %v3151_v0 }
 0x154   : > { %1077 = vmatmul.mubr.bf16.gmra.mrb[64].mxu0 %v942_v20 }
 0x155   : > { %1086 = vmatprep.mubr.bf16.mxu0 %v3151_v0 }
 0x15c   : > { %1087 = vmatmul.mubr.bf16.gmra.mrb[68].mxu0 %v943_v23 }
 0x15d   : > { %1096 = vmatprep.mubr.bf16.mxu0 %v3151_v0 }
 0x164   : > { %1097 = vmatmul.mubr.bf16.gmra.mrb[72].mxu0 %v944_v26 }
 0x165   : > { %1106 = vmatprep.mubr.bf16.mxu0 %v3151_v0 }
 0x16c   : > { %1107 = vmatmul.mubr.bf16.gmra.mrb[76].mxu0 %v945_v29 }
 0x16d   : > { %1116 = vmatprep.mubr.bf16.mxu0 %v3151_v0 }
 0x174   : > { %1117 = vmatmul.mubr.bf16.gmra.mrb[80].mxu0 %v946_v32 }
 0x175   : > { %1126 = vmatprep.mubr.bf16.mxu0 %v3151_v0 }
 0x17c   : > { %1127 = vmatmul.mubr.bf16.gmra.mrb[84].mxu0 %v947_v35 }
 0x17d   : > { %1136 = vmatprep.mubr.bf16.mxu0 %v3151_v0 }
 0x184   : > { %1137 = vmatmul.mubr.bf16.gmra.mrb[88].mxu0 %v948_v38 }
 0x185   : > { %1146 = vmatprep.mubr.bf16.mxu0 %v3151_v0 }
 0x18c   : > { %1147 = vmatmul.mubr.bf16.gmra.mrb[92].mxu0 %v949_v44 }
 0x18d   : > { %1156 = vmatprep.mubr.bf16.mxu0 %v3151_v0 }
 0x194   : > { %1157 = vmatmul.mubr.bf16.gmra.mrb[96].mxu0 %v950_v51 }
 0x195   : > { %1166 = vmatprep.mubr.bf16.mxu0 %v3151_v0 }
 0x19c   : > { %1167 = vmatmul.mubr.bf16.gmra.mrb[100].mxu0 %v951_v58 }
 0x19d   : > { %1176 = vmatprep.mubr.bf16.mxu0 %v3151_v0 }
 0x1a4   : > { %1177 = vmatmul.mubr.bf16.gmra.mrb[104].mxu0 %v952_v6 }
 0x1a5   : > { %1186 = vmatprep.mubr.bf16.mxu0 %v3151_v0 }
 0x1a7   : > { %v589_v13 = vpop.f32.mrb[0].mxu0 }
 0x1a8   : > { %v590_v14 = vadd.f32 %v589_v13, %v3533_v9  ;;  %v591_v15 = vpop.f32.mrb[1].mxu0 }
 0x1a9   : > { %v592_v17 = vadd.f32 %v591_v15, %v3535_v10  ;;  %v593_v18 = vpop.f32.mrb[2].mxu0 }
 0x1aa   : > { %v594_v19 = vadd.f32 %v593_v18, %v3533_v9  ;;  %v595_v20 = vpop.f32.mrb[3].mxu0  ;;  %v658_v22 = vmax.f32 %v590_v14, 0.0 }
 0x1ab   : > { %v596_v21 = vadd.f32 %v595_v20, %v3535_v10  ;;  %v659_v24 = vmax.f32 %v592_v17, 0.0 }
 0x1ac   : > { %v660_v23 = vmax.f32 %v594_v19, 0.0  ;;  %1187 = vmatmul.mubr.bf16.gmra.mrb[108].mxu0 %v953_v16 }
 0x1ad   : > { %v661_v25 = vmax.f32 %v596_v21, 0.0 }
 0x1ae   : > { %v686_v26 = vpack.c.bf16 %v660_v23, %v658_v22 }
 0x1af   : > { %v599_v27 = vpop.f32.mrb[4].mxu0  ;;  %v687_v28 = vpack.c.bf16 %v661_v25, %v659_v24 }
 0x1b0   : > { %v600_v29 = vadd.f32 %v599_v27, %v3533_v9  ;;  %v601_v30 = vpop.f32.mrb[5].mxu0 }
 0x1b1   : > { %v602_v31 = vadd.f32 %v601_v30, %v3535_v10  ;;  %v603_v32 = vpop.f32.mrb[6].mxu0  ;;  %834 = vmatprep.mubr.bf16.mxu1 %v687_v28 }
 0x1b2   : > { %v662_v33 = vmax.f32 %v600_v29, 0.0  ;;  %v604_v34 = vadd.f32 %v603_v32, %v3533_v9  ;;  %v605_v35 = vpop.f32.mrb[7].mxu0  ;;  %835 = vmatmul.mubr.bf16.vlgmr.msra.gmra.mrb[0].mxu1 %v686_v26 }
 0x1b3   : > { %v663_v36 = vmax.f32 %v602_v31, 0.0  ;;  %v606_v37 = vadd.f32 %v605_v35, %v3535_v10  ;;  %1324 = vmatpush1.bf16.msra.mxu1 %v3426_v42 }
 0x1b4   : > { %v664_v38 = vmax.f32 %v604_v34, 0.0  ;;  %1325 = vmatprep.subr.bf16.mxu1 %v3151_v0 }
 0x1b5   : > { %v665_v39 = vmax.f32 %v606_v37, 0.0 }
 0x1b6   : > { %v688_v40 = vpack.c.bf16 %v664_v38, %v662_v33 }
 0x1b7   : > { %v689_v44 = vpack.c.bf16 %v665_v39, %v663_v36  ;;  %1326 = vmatpush1.bf16.msra.mxu1 %v3435_v46  ;;  %v609_v45 = vpop.f32.mrb[8].mxu0 }
 0x1b8   : > { %v610_v47 = vadd.f32 %v609_v45, %v3533_v9  ;;  %v611_v51 = vpop.f32.mrb[9].mxu0  ;;  %1327 = vmatprep.subr.bf16.mxu1 %v3151_v0 }
 0x1b9   : > { %v612_v52 = vadd.f32 %v611_v51, %v3535_v10  ;;  %v613_v54 = vpop.f32.mrb[10].mxu0  ;;  %842 = vmatprep.mubr.bf16.mxu1 %v689_v44 }
 0x1ba   : > { %v666_v58 = vmax.f32 %v610_v47, 0.0  ;;  %v614_v42 = vadd.f32 %v613_v54, %v3533_v9  ;;  %v615_v59 = vpop.f32.mrb[11].mxu0  ;;  %843 = vmatmul.mubr.bf16.gmra.mrb[4].mxu1 %v688_v40 }
 0x1bb   : > { %v667_v61 = vmax.f32 %v612_v52, 0.0  ;;  %v616_v62 = vadd.f32 %v615_v59, %v3535_v10  ;;  %1328 = vmatpush1.bf16.msra.mxu1 %v3441_v49 }
 0x1bc   : > { %v668_v46 = vmax.f32 %v614_v42, 0.0  ;;  %1329 = vmatprep.subr.bf16.mxu1 %v3151_v0 }
 0x1bd   : > { %v669_v63 = vmax.f32 %v616_v62, 0.0 }
 0x1be   : > { %v690_v2 = vpack.c.bf16 %v668_v46, %v666_v58 }
 0x1bf   : > { %v691_v6 = vpack.c.bf16 %v669_v63, %v667_v61  ;;  %1330 = vmatpush1.bf16.msra.mxu1 %v3450_v53  ;;  %v619_v7 = vpop.f32.mrb[12].mxu0 }
 0x1c0   : > { %v620_v8 = vadd.f32 %v619_v7, %v3533_v9  ;;  %v621_v11 = vpop.f32.mrb[13].mxu0  ;;  %1331 = vmatprep.subr.bf16.mxu1 %v3151_v0 }
 0x1c1   : > { %v622_v12 = vadd.f32 %v621_v11, %v3535_v10  ;;  %v623_v13 = vpop.f32.mrb[14].mxu0  ;;  %850 = vmatprep.mubr.bf16.mxu1 %v691_v6 }
 0x1c2   : > { %v670_v14 = vmax.f32 %v620_v8, 0.0  ;;  %v624_v49 = vadd.f32 %v623_v13, %v3533_v9  ;;  %v625_v15 = vpop.f32.mrb[15].mxu0  ;;  %851 = vmatmul.mubr.bf16.gmra.mrb[8].mxu1 %v690_v2 }
 0x1c3   : > { %v671_v16 = vmax.f32 %v622_v12, 0.0  ;;  %v626_v17 = vadd.f32 %v625_v15, %v3535_v10  ;;  %1332 = vmatpush1.bf16.msra.mxu1 %v3456_v56 }
 0x1c4   : > { %v672_v53 = vmax.f32 %v624_v49, 0.0  ;;  %1333 = vmatprep.subr.bf16.mxu1 %v3151_v0 }
 0x1c5   : > { %v673_v18 = vmax.f32 %v626_v17, 0.0 }
 0x1c6   : > { %v692_v19 = vpack.c.bf16 %v672_v53, %v670_v14 }
 0x1c7   : > { %v693_v20 = vpack.c.bf16 %v673_v18, %v671_v16  ;;  %1334 = vmatpush1.bf16.msra.mxu1 %v3465_v60  ;;  %v629_v21 = vpop.f32.mrb[16].mxu0 }
 0x1c8   : > { %v630_v22 = vadd.f32 %v629_v21, %v3533_v9  ;;  %v631_v23 = vpop.f32.mrb[17].mxu0  ;;  %1335 = vmatprep.subr.bf16.mxu1 %v3151_v0 }
 0x1c9   : > { %v632_v24 = vadd.f32 %v631_v23, %v3535_v10  ;;  %v633_v25 = vpop.f32.mrb[18].mxu0  ;;  %858 = vmatprep.mubr.bf16.mxu1 %v693_v20 }
 0x1ca   : > { %v674_v26 = vmax.f32 %v630_v22, 0.0  ;;  %v634_v56 = vadd.f32 %v633_v25, %v3533_v9  ;;  %v635_v27 = vpop.f32.mrb[19].mxu0  ;;  %859 = vmatmul.mubr.bf16.gmra.mrb[12].mxu1 %v692_v19 }
 0x1cb   : > { %v675_v28 = vmax.f32 %v632_v24, 0.0  ;;  %v636_v29 = vadd.f32 %v635_v27, %v3535_v10  ;;  %1336 = vmatpush1.bf16.msra.mxu1 %v3474_v3 }
 0x1cc   : > { %v676_v60 = vmax.f32 %v634_v56, 0.0  ;;  %1337 = vmatprep.subr.bf16.mxu1 %v3151_v0 }
 0x1cd   : > { %v677_v30 = vmax.f32 %v636_v29, 0.0 }
 0x1ce   : > { %v694_v31 = vpack.c.bf16 %v676_v60, %v674_v26 }
 0x1cf   : > { %v695_v32 = vpack.c.bf16 %v677_v30, %v675_v28  ;;  %1338 = vmatpush1.bf16.msra.mxu1 %v3480_v5  ;;  %v639_v33 = vpop.f32.mrb[20].mxu0 }
 0x1d0   : > { %v640_v34 = vadd.f32 %v639_v33, %v3533_v9  ;;  %v641_v35 = vpop.f32.mrb[21].mxu0  ;;  %1339 = vmatprep.subr.bf16.mxu1 %v3151_v0 }
 0x1d1   : > { %v642_v36 = vadd.f32 %v641_v35, %v3535_v10  ;;  %v643_v37 = vpop.f32.mrb[22].mxu0  ;;  %866 = vmatprep.mubr.bf16.mxu1 %v695_v32 }
 0x1d2   : > { %v678_v38 = vmax.f32 %v640_v34, 0.0  ;;  %v644_v3 = vadd.f32 %v643_v37, %v3533_v9  ;;  %v645_v39 = vpop.f32.mrb[23].mxu0  ;;  %867 = vmatmul.mubr.bf16.gmra.mrb[16].mxu1 %v694_v31 }
 0x1d3   : > { %v679_v40 = vmax.f32 %v642_v36, 0.0  ;;  %v646_v44 = vadd.f32 %v645_v39, %v3535_v10  ;;  %1340 = vmatpush1.bf16.msra.mxu1 %v3424_v41 }
 0x1d4   : > { %v680_v5 = vmax.f32 %v644_v3, 0.0  ;;  %1341 = vmatprep.subr.bf16.mxu1 %v3151_v0 }
 0x1d5   : > { %v681_v45 = vmax.f32 %v646_v44, 0.0 }
 0x1d6   : > { %v696_v47 = vpack.c.bf16 %v680_v5, %v678_v38 }
 0x1d7   : > { %v697_v51 = vpack.c.bf16 %v681_v45, %v679_v40  ;;  %1342 = vmatpush1.bf16.msra.mxu1 %v3428_v43  ;;  %v649_v52 = vpop.f32.mrb[24].mxu0 }
 0x1d8   : > { %v650_v54 = vadd.f32 %v649_v52, %v3533_v9  ;;  %v651_v58 = vpop.f32.mrb[25].mxu0  ;;  %1343 = vmatprep.subr.bf16.mxu1 %v3151_v0 }
 0x1d9   : > { %v652_v42 = vadd.f32 %v651_v58, %v3535_v10  ;;  %v653_v59 = vpop.f32.mrb[26].mxu0  ;;  %874 = vmatprep.mubr.bf16.mxu1 %v697_v51 }
 0x1da   : > { %v682_v61 = vmax.f32 %v650_v54, 0.0  ;;  %v654_v41 = vadd.f32 %v653_v59, %v3533_v9  ;;  %v655_v62 = vpop.f32.mrb[27].mxu0  ;;  %875 = vmatmul.mubr.bf16.gmra.mrb[20].mxu1 %v696_v47 }
 0x1db   : > { %v683_v46 = vmax.f32 %v652_v42, 0.0  ;;  %v656_v63 = vadd.f32 %v655_v62, %v3535_v10  ;;  %1344 = vmatpush1.bf16.msra.mxu1 %v3439_v48 }
 0x1dc   : > { %v684_v43 = vmax.f32 %v654_v41, 0.0  ;;  %1345 = vmatprep.subr.bf16.mxu1 %v3151_v0 }
 0x1dd   : > { %v685_v2 = vmax.f32 %v656_v63, 0.0 }
 0x1de   : > { %v698_v6 = vpack.c.bf16 %v684_v43, %v682_v61 }
 0x1df   : > { %v699_v7 = vpack.c.bf16 %v685_v2, %v683_v46  ;;  %1346 = vmatpush1.bf16.msra.mxu1 %v3443_v50  ;;  %v988_v8 = vpop.f32.mrb[28].mxu0 }
 0x1e0   : > { %1347 = vmatprep.subr.bf16.mxu1 %v3151_v0  ;;  %v989_v11 = vadd.f32 %v988_v8, %v3533_v9  ;;  %v990_v12 = vpop.f32.mrb[29].mxu0 }
 0x1e1   : > { %882 = vmatprep.mubr.bf16.mxu1 %v699_v7  ;;  %v991_v13 = vadd.f32 %v990_v12, %v3535_v10  ;;  %v992_v14 = vpop.f32.mrb[30].mxu0 }
 0x1e2   : > { %883 = vmatmul.mubr.bf16.gmra.mrb[24].mxu1 %v698_v6  ;;  %v1197_v48 = vmax.f32 %v989_v11, 0.0  ;;  %v993_v49 = vadd.f32 %v992_v14, %v3533_v9  ;;  %v994_v15 = vpop.f32.mrb[31].mxu0 }
 0x1e3   : > { %1348 = vmatpush1.bf16.msra.mxu1 %v3454_v55  ;;  %v1198_v16 = vmax.f32 %v991_v13, 0.0  ;;  %v995_v50 = vadd.f32 %v994_v15, %v3535_v10 }
 0x1e4   : > { %v1199_v17 = vmax.f32 %v993_v49, 0.0  ;;  %1349 = vmatprep.subr.bf16.mxu1 %v3151_v0 }
 0x1e5   : > { %v1200_v53 = vmax.f32 %v995_v50, 0.0 }
 0x1e6   : > { %v1281_v18 = vpack.c.bf16 %v1199_v17, %v1197_v48 }
 0x1e7   : > { %v1282_v19 = vpack.c.bf16 %v1200_v53, %v1198_v16  ;;  %1350 = vmatpush1.bf16.msra.mxu1 %v3458_v57  ;;  %v998_v20 = vpop.f32.mrb[32].mxu0 }
 0x1e8   : > { %1351 = vmatprep.subr.bf16.mxu1 %v3151_v0  ;;  %v999_v21 = vadd.f32 %v998_v20, %v3533_v9  ;;  %v1000_v22 = vpop.f32.mrb[33].mxu0 }
 0x1e9   : > { %v1001_v23 = vadd.f32 %v1000_v22, %v3535_v10  ;;  %v1002_v55 = vpop.f32.mrb[34].mxu0  ;;  %1355 = vmatprep.mubr.bf16.mxu1 %v1282_v19 }
 0x1ea   : > { %v1201_v24 = vmax.f32 %v999_v21, 0.0  ;;  %v1003_v25 = vadd.f32 %v1002_v55, %v3533_v9  ;;  %v1004_v26 = vpop.f32.mrb[35].mxu0 }
 0x1eb   : > { %1352 = vmatpush1.bf16.msra.mxu1 %v3472_v1  ;;  %v1202_v56 = vmax.f32 %v1001_v23, 0.0  ;;  %v1005_v27 = vadd.f32 %v1004_v26, %v3535_v10 }
 0x1ec   : > { %v1203_v57 = vmax.f32 %v1003_v25, 0.0  ;;  %1353 = vmatprep.subr.bf16.mxu1 %v3151_v0 }
 0x1ed   : > { %v1204_v28 = vmax.f32 %v1005_v27, 0.0 }
 0x1ee   : > { %v1283_v29 = vpack.c.bf16 %v1203_v57, %v1201_v24 }
 0x1ef   : > { %v1284_v60 = vpack.c.bf16 %v1204_v28, %v1202_v56  ;;  %1354 = vmatpush1.bf16.msra.mxu1 %v3478_v4  ;;  %v1008_v30 = vpop.f32.mrb[36].mxu0 }
 0x1f0   : > { %v1009_v31 = vadd.f32 %v1008_v30, %v3533_v9  ;;  %v1010_v32 = vpop.f32.mrb[37].mxu0 }
 0x1f1   : > { %v1011_v33 = vadd.f32 %v1010_v32, %v3535_v10  ;;  %v1012_v34 = vpop.f32.mrb[38].mxu0 }
 0x1f2   : > { %1356 = vmatmul.mubr.bf16.vlgmr.msra.gmra.mrb[28].mxu1 %v1281_v18  ;;  %v1205_v1 = vmax.f32 %v1009_v31, 0.0  ;;  %v1013_v35 = vadd.f32 %v1012_v34, %v3533_v9  ;;  %v1014_v36 = vpop.f32.mrb[39].mxu0 }
 0x1f3   : > { %v1206_v37 = vmax.f32 %v1011_v33, 0.0  ;;  %1363 = vmatprep.mubr.bf16.mxu1 %v1284_v60  ;;  %v1015_v0 = vadd.f32 %v1014_v36, %v3535_v10 }
 0x1f4   : > { %v1207_v38 = vmax.f32 %v1013_v35, 0.0 }
 0x1f5   : > { %v1208_v3 = vmax.f32 %v1015_v0, 0.0 }
 0x1f6   : > { %v1285_v39 = vpack.c.bf16 %v1207_v38, %v1205_v1 }
 0x1f7   : > { %v1286_v4 = vpack.c.bf16 %v1208_v3, %v1206_v37  ;;  %v1018_v40 = vpop.f32.mrb[40].mxu0 }
 0x1f8   : > { %v1019_v44 = vadd.f32 %v1018_v40, %v3533_v9  ;;  %v1020_v5 = vpop.f32.mrb[41].mxu0 }
 0x1f9   : > { %v1021_v45 = vadd.f32 %v1020_v5, %v3535_v10  ;;  %v1022_v47 = vpop.f32.mrb[42].mxu0 }
 0x1fa   : > { %1364 = vmatmul.mubr.bf16.gmra.mrb[32].mxu1 %v1283_v29  ;;  %v1209_v51 = vmax.f32 %v1019_v44, 0.0  ;;  %v1023_v52 = vadd.f32 %v1022_v47, %v3533_v9  ;;  %v1024_v54 = vpop.f32.mrb[43].mxu0 }
 0x1fb   : > { %v1210_v58 = vmax.f32 %v1021_v45, 0.0  ;;  %1371 = vmatprep.mubr.bf16.mxu1 %v1286_v4  ;;  %v1025_v42 = vadd.f32 %v1024_v54, %v3535_v10 }
 0x1fc   : > { %v1211_v59 = vmax.f32 %v1023_v52, 0.0 }
 0x1fd   : > { %v1212_v61 = vmax.f32 %v1025_v42, 0.0 }
 0x1fe   : > { %v1287_v41 = vpack.c.bf16 %v1211_v59, %v1209_v51 }
 0x1ff   : > { %v1288_v62 = vpack.c.bf16 %v1212_v61, %v1210_v58  ;;  %v1028_v46 = vpop.f32.mrb[44].mxu0 }
 0x200   : > { %v1029_v63 = vadd.f32 %v1028_v46, %v3533_v9  ;;  %v1030_v43 = vpop.f32.mrb[45].mxu0 }
 0x201   : > { %v1031_v2 = vadd.f32 %v1030_v43, %v3535_v10  ;;  %v1032_v6 = vpop.f32.mrb[46].mxu0 }
 0x202   : > { %1372 = vmatmul.mubr.bf16.gmra.mrb[36].mxu1 %v1285_v39  ;;  %v1213_v7 = vmax.f32 %v1029_v63, 0.0  ;;  %v1033_v8 = vadd.f32 %v1032_v6, %v3533_v9  ;;  %v1034_v11 = vpop.f32.mrb[47].mxu0 }
 0x203   : > { %v1214_v12 = vmax.f32 %v1031_v2, 0.0  ;;  %1379 = vmatprep.mubr.bf16.mxu1 %v1288_v62  ;;  %v1035_v13 = vadd.f32 %v1034_v11, %v3535_v10 }
 0x204   : > { %v1215_v14 = vmax.f32 %v1033_v8, 0.0 }
 0x205   : > { %v1216_v48 = vmax.f32 %v1035_v13, 0.0 }
 0x206   : > { %v1289_v49 = vpack.c.bf16 %v1215_v14, %v1213_v7 }
 0x207   : > { %v1290_v15 = vpack.c.bf16 %v1216_v48, %v1214_v12  ;;  %v1038_v16 = vpop.f32.mrb[48].mxu0 }
 0x208   : > { %v1039_v50 = vadd.f32 %v1038_v16, %v3533_v9  ;;  %v1040_v17 = vpop.f32.mrb[49].mxu0 }
 0x209   : > { %v1041_v53 = vadd.f32 %v1040_v17, %v3535_v10  ;;  %v1042_v18 = vpop.f32.mrb[50].mxu0 }
 0x20a   : > { %1380 = vmatmul.mubr.bf16.gmra.mrb[40].mxu1 %v1287_v41  ;;  %v1217_v19 = vmax.f32 %v1039_v50, 0.0  ;;  %v1043_v20 = vadd.f32 %v1042_v18, %v3533_v9  ;;  %v1044_v21 = vpop.f32.mrb[51].mxu0 }
 0x20b   : > { %v1218_v22 = vmax.f32 %v1041_v53, 0.0  ;;  %1387 = vmatprep.mubr.bf16.mxu1 %v1290_v15  ;;  %v1045_v23 = vadd.f32 %v1044_v21, %v3535_v10 }
 0x20c   : > { %v1219_v55 = vmax.f32 %v1043_v20, 0.0 }
 0x20d   : > { %v1220_v24 = vmax.f32 %v1045_v23, 0.0 }
 0x20e   : > { %v1291_v25 = vpack.c.bf16 %v1219_v55, %v1217_v19 }
 0x20f   : > { %v1292_v26 = vpack.c.bf16 %v1220_v24, %v1218_v22  ;;  %v1048_v56 = vpop.f32.mrb[52].mxu0 }
 0x210   : > { %v1049_v27 = vadd.f32 %v1048_v56, %v3533_v9  ;;  %v1050_v57 = vpop.f32.mrb[53].mxu0 }
 0x211   : > { %v1051_v28 = vadd.f32 %v1050_v57, %v3535_v10  ;;  %v1052_v29 = vpop.f32.mrb[54].mxu0 }
 0x212   : > { %1388 = vmatmul.mubr.bf16.gmra.mrb[44].mxu1 %v1289_v49  ;;  %v1221_v60 = vmax.f32 %v1049_v27, 0.0  ;;  %v1053_v30 = vadd.f32 %v1052_v29, %v3533_v9  ;;  %v1054_v31 = vpop.f32.mrb[55].mxu0 }
 0x213   : > { %v1222_v32 = vmax.f32 %v1051_v28, 0.0  ;;  %1395 = vmatprep.mubr.bf16.mxu1 %v1292_v26  ;;  %v1055_v33 = vadd.f32 %v1054_v31, %v3535_v10 }
 0x214   : > { %v1223_v34 = vmax.f32 %v1053_v30, 0.0 }
 0x215   : > { %v1224_v1 = vmax.f32 %v1055_v33, 0.0 }
 0x216   : > { %v1293_v35 = vpack.c.bf16 %v1223_v34, %v1221_v60 }
 0x217   : > { %v1294_v36 = vpack.c.bf16 %v1224_v1, %v1222_v32  ;;  %v1058_v37 = vpop.f32.mrb[56].mxu0 }
 0x218   : > { %v1059_v0 = vadd.f32 %v1058_v37, %v3533_v9  ;;  %v1060_v38 = vpop.f32.mrb[57].mxu0 }
 0x219   : > { %v1061_v3 = vadd.f32 %v1060_v38, %v3535_v10  ;;  %v1062_v39 = vpop.f32.mrb[58].mxu0 }
 0x21a   : > { %1396 = vmatmul.mubr.bf16.gmra.mrb[48].mxu1 %v1291_v25  ;;  %v1225_v4 = vmax.f32 %v1059_v0, 0.0  ;;  %v1063_v40 = vadd.f32 %v1062_v39, %v3533_v9  ;;  %v1064_v44 = vpop.f32.mrb[59].mxu0 }
 0x21b   : > { %v1226_v5 = vmax.f32 %v1061_v3, 0.0  ;;  %1403 = vmatprep.mubr.bf16.mxu1 %v1294_v36  ;;  %v1065_v45 = vadd.f32 %v1064_v44, %v3535_v10 }
 0x21c   : > { %v1227_v47 = vmax.f32 %v1063_v40, 0.0 }
 0x21d   : > { %v1228_v51 = vmax.f32 %v1065_v45, 0.0 }
 0x21e   : > { %v1295_v52 = vpack.c.bf16 %v1227_v47, %v1225_v4 }
 0x21f   : > { %v1296_v54 = vpack.c.bf16 %v1228_v51, %v1226_v5  ;;  %v1068_v58 = vpop.f32.mrb[60].mxu0 }
 0x220   : > { %v1069_v42 = vadd.f32 %v1068_v58, %v3533_v9  ;;  %v1070_v59 = vpop.f32.mrb[61].mxu0 }
 0x221   : > { %v1071_v61 = vadd.f32 %v1070_v59, %v3535_v10  ;;  %v1072_v41 = vpop.f32.mrb[62].mxu0 }
 0x222   : > { %1404 = vmatmul.mubr.bf16.gmra.mrb[52].mxu1 %v1293_v35  ;;  %v1229_v62 = vmax.f32 %v1069_v42, 0.0  ;;  %v1073_v46 = vadd.f32 %v1072_v41, %v3533_v9  ;;  %v1074_v63 = vpop.f32.mrb[63].mxu0 }
 0x223   : > { %v1230_v43 = vmax.f32 %v1071_v61, 0.0  ;;  %1411 = vmatprep.mubr.bf16.mxu1 %v1296_v54  ;;  %v1075_v2 = vadd.f32 %v1074_v63, %v3535_v10 }
 0x224   : > { %v1231_v6 = vmax.f32 %v1073_v46, 0.0 }
 0x225   : > { %v1232_v7 = vmax.f32 %v1075_v2, 0.0 }
 0x226   : > { %v1297_v8 = vpack.c.bf16 %v1231_v6, %v1229_v62 }
 0x227   : > { %v1298_v11 = vpack.c.bf16 %v1232_v7, %v1230_v43  ;;  %v1078_v12 = vpop.f32.mrb[64].mxu0 }
 0x228   : > { %v1079_v13 = vadd.f32 %v1078_v12, %v3533_v9  ;;  %v1080_v14 = vpop.f32.mrb[65].mxu0 }
 0x229   : > { %v1081_v48 = vadd.f32 %v1080_v14, %v3535_v10  ;;  %v1082_v49 = vpop.f32.mrb[66].mxu0 }
 0x22a   : > { %1412 = vmatmul.mubr.bf16.gmra.mrb[56].mxu1 %v1295_v52  ;;  %v1233_v15 = vmax.f32 %v1079_v13, 0.0  ;;  %v1083_v16 = vadd.f32 %v1082_v49, %v3533_v9  ;;  %v1084_v50 = vpop.f32.mrb[67].mxu0 }
 0x22b   : > { %v1234_v17 = vmax.f32 %v1081_v48, 0.0  ;;  %1419 = vmatprep.mubr.bf16.mxu1 %v1298_v11  ;;  %v1085_v53 = vadd.f32 %v1084_v50, %v3535_v10 }
 0x22c   : > { %v1235_v18 = vmax.f32 %v1083_v16, 0.0 }
 0x22d   : > { %v1236_v19 = vmax.f32 %v1085_v53, 0.0 }
 0x22e   : > { %v1299_v20 = vpack.c.bf16 %v1235_v18, %v1233_v15 }
 0x22f   : > { %v1300_v21 = vpack.c.bf16 %v1236_v19, %v1234_v17  ;;  %v1088_v22 = vpop.f32.mrb[68].mxu0 }
 0x230   : > { %v1089_v23 = vadd.f32 %v1088_v22, %v3533_v9  ;;  %v1090_v55 = vpop.f32.mrb[69].mxu0 }
 0x231   : > { %v1091_v24 = vadd.f32 %v1090_v55, %v3535_v10  ;;  %v1092_v25 = vpop.f32.mrb[70].mxu0 }
 0x232   : > { %1420 = vmatmul.mubr.bf16.gmra.mrb[60].mxu1 %v1297_v8  ;;  %v1237_v26 = vmax.f32 %v1089_v23, 0.0  ;;  %v1093_v56 = vadd.f32 %v1092_v25, %v3533_v9  ;;  %v1094_v27 = vpop.f32.mrb[71].mxu0 }
 0x233   : > { %v1238_v57 = vmax.f32 %v1091_v24, 0.0  ;;  %1427 = vmatprep.mubr.bf16.mxu1 %v1300_v21  ;;  %v1095_v28 = vadd.f32 %v1094_v27, %v3535_v10 }
 0x234   : > { %v1239_v29 = vmax.f32 %v1093_v56, 0.0 }
 0x235   : > { %v1240_v60 = vmax.f32 %v1095_v28, 0.0 }
 0x236   : > { %v1301_v30 = vpack.c.bf16 %v1239_v29, %v1237_v26 }
 0x237   : > { %v1302_v31 = vpack.c.bf16 %v1240_v60, %v1238_v57  ;;  %v1098_v32 = vpop.f32.mrb[72].mxu0 }
 0x238   : > { %v1099_v33 = vadd.f32 %v1098_v32, %v3533_v9  ;;  %v1100_v34 = vpop.f32.mrb[73].mxu0 }
 0x239   : > { %v1101_v1 = vadd.f32 %v1100_v34, %v3535_v10  ;;  %v1102_v35 = vpop.f32.mrb[74].mxu0 }
 0x23a   : > { %1428 = vmatmul.mubr.bf16.gmra.mrb[64].mxu1 %v1299_v20  ;;  %v1241_v36 = vmax.f32 %v1099_v33, 0.0  ;;  %v1103_v37 = vadd.f32 %v1102_v35, %v3533_v9  ;;  %v1104_v0 = vpop.f32.mrb[75].mxu0 }
 0x23b   : > { %v1242_v38 = vmax.f32 %v1101_v1, 0.0  ;;  %1435 = vmatprep.mubr.bf16.mxu1 %v1302_v31  ;;  %v1105_v3 = vadd.f32 %v1104_v0, %v3535_v10 }
 0x23c   : > { %v1243_v39 = vmax.f32 %v1103_v37, 0.0 }
 0x23d   : > { %v1244_v4 = vmax.f32 %v1105_v3, 0.0 }
 0x23e   : > { %v1303_v40 = vpack.c.bf16 %v1243_v39, %v1241_v36 }
 0x23f   : > { %v1304_v44 = vpack.c.bf16 %v1244_v4, %v1242_v38  ;;  %v1108_v5 = vpop.f32.mrb[76].mxu0 }
 0x240   : > { %v1109_v45 = vadd.f32 %v1108_v5, %v3533_v9  ;;  %v1110_v47 = vpop.f32.mrb[77].mxu0 }
 0x241   : > { %v1111_v51 = vadd.f32 %v1110_v47, %v3535_v10  ;;  %v1112_v52 = vpop.f32.mrb[78].mxu0 }
 0x242   : > { %1436 = vmatmul.mubr.bf16.gmra.mrb[68].mxu1 %v1301_v30  ;;  %v1245_v54 = vmax.f32 %v1109_v45, 0.0  ;;  %v1113_v58 = vadd.f32 %v1112_v52, %v3533_v9  ;;  %v1114_v42 = vpop.f32.mrb[79].mxu0 }
 0x243   : > { %v1246_v59 = vmax.f32 %v1111_v51, 0.0  ;;  %1443 = vmatprep.mubr.bf16.mxu1 %v1304_v44  ;;  %v1115_v61 = vadd.f32 %v1114_v42, %v3535_v10 }
 0x244   : > { %v1247_v41 = vmax.f32 %v1113_v58, 0.0 }
 0x245   : > { %v1248_v62 = vmax.f32 %v1115_v61, 0.0 }
 0x246   : > { %v1305_v46 = vpack.c.bf16 %v1247_v41, %v1245_v54 }
 0x247   : > { %v1306_v63 = vpack.c.bf16 %v1248_v62, %v1246_v59  ;;  %v1118_v43 = vpop.f32.mrb[80].mxu0 }
 0x248   : > { %v1119_v2 = vadd.f32 %v1118_v43, %v3533_v9  ;;  %v1120_v6 = vpop.f32.mrb[81].mxu0 }
 0x249   : > { %v1121_v7 = vadd.f32 %v1120_v6, %v3535_v10  ;;  %v1122_v8 = vpop.f32.mrb[82].mxu0 }
 0x24a   : > { %1444 = vmatmul.mubr.bf16.gmra.mrb[72].mxu1 %v1303_v40  ;;  %v1249_v11 = vmax.f32 %v1119_v2, 0.0  ;;  %v1123_v12 = vadd.f32 %v1122_v8, %v3533_v9  ;;  %v1124_v13 = vpop.f32.mrb[83].mxu0 }
 0x24b   : > { %v1250_v14 = vmax.f32 %v1121_v7, 0.0  ;;  %1451 = vmatprep.mubr.bf16.mxu1 %v1306_v63  ;;  %v1125_v48 = vadd.f32 %v1124_v13, %v3535_v10 }
 0x24c   : > { %v1251_v49 = vmax.f32 %v1123_v12, 0.0 }
 0x24d   : > { %v1252_v15 = vmax.f32 %v1125_v48, 0.0 }
 0x24e   : > { %v1307_v16 = vpack.c.bf16 %v1251_v49, %v1249_v11 }
 0x24f   : > { %v1308_v50 = vpack.c.bf16 %v1252_v15, %v1250_v14  ;;  %v1128_v17 = vpop.f32.mrb[84].mxu0 }
 0x250   : > { %v1129_v53 = vadd.f32 %v1128_v17, %v3533_v9  ;;  %v1130_v18 = vpop.f32.mrb[85].mxu0 }
 0x251   : > { %v1131_v19 = vadd.f32 %v1130_v18, %v3535_v10  ;;  %v1132_v20 = vpop.f32.mrb[86].mxu0 }
 0x252   : > { %1452 = vmatmul.mubr.bf16.gmra.mrb[76].mxu1 %v1305_v46  ;;  %v1253_v21 = vmax.f32 %v1129_v53, 0.0  ;;  %v1133_v22 = vadd.f32 %v1132_v20, %v3533_v9  ;;  %v1134_v23 = vpop.f32.mrb[87].mxu0 }
 0x253   : > { %v1254_v55 = vmax.f32 %v1131_v19, 0.0  ;;  %1459 = vmatprep.mubr.bf16.mxu1 %v1308_v50  ;;  %v1135_v24 = vadd.f32 %v1134_v23, %v3535_v10 }
 0x254   : > { %v1255_v25 = vmax.f32 %v1133_v22, 0.0 }
 0x255   : > { %v1256_v26 = vmax.f32 %v1135_v24, 0.0 }
 0x256   : > { %v1309_v56 = vpack.c.bf16 %v1255_v25, %v1253_v21 }
 0x257   : > { %v1310_v27 = vpack.c.bf16 %v1256_v26, %v1254_v55  ;;  %v1138_v57 = vpop.f32.mrb[88].mxu0 }
 0x258   : > { %v1139_v28 = vadd.f32 %v1138_v57, %v3533_v9  ;;  %v1140_v29 = vpop.f32.mrb[89].mxu0 }
 0x259   : > { %v1141_v60 = vadd.f32 %v1140_v29, %v3535_v10  ;;  %v1142_v30 = vpop.f32.mrb[90].mxu0 }
 0x25a   : > { %1460 = vmatmul.mubr.bf16.gmra.mrb[80].mxu1 %v1307_v16  ;;  %v1257_v31 = vmax.f32 %v1139_v28, 0.0  ;;  %v1143_v32 = vadd.f32 %v1142_v30, %v3533_v9  ;;  %v1144_v33 = vpop.f32.mrb[91].mxu0 }
 0x25b   : > { %v1258_v34 = vmax.f32 %v1141_v60, 0.0  ;;  %1467 = vmatprep.mubr.bf16.mxu1 %v1310_v27  ;;  %v1145_v1 = vadd.f32 %v1144_v33, %v3535_v10 }
 0x25c   : > { %v1259_v35 = vmax.f32 %v1143_v32, 0.0 }
 0x25d   : > { %v1260_v36 = vmax.f32 %v1145_v1, 0.0 }
 0x25e   : > { %v1311_v37 = vpack.c.bf16 %v1259_v35, %v1257_v31 }
 0x25f   : > { %v1312_v0 = vpack.c.bf16 %v1260_v36, %v1258_v34  ;;  %v1148_v38 = vpop.f32.mrb[92].mxu0 }
 0x260   : > { %v1149_v3 = vadd.f32 %v1148_v38, %v3533_v9  ;;  %v1150_v39 = vpop.f32.mrb[93].mxu0 }
 0x261   : > { %v1151_v4 = vadd.f32 %v1150_v39, %v3535_v10  ;;  %v1152_v40 = vpop.f32.mrb[94].mxu0 }
 0x262   : > { %1468 = vmatmul.mubr.bf16.gmra.mrb[84].mxu1 %v1309_v56  ;;  %v1261_v44 = vmax.f32 %v1149_v3, 0.0  ;;  %v1153_v5 = vadd.f32 %v1152_v40, %v3533_v9  ;;  %v1154_v45 = vpop.f32.mrb[95].mxu0 }
 0x263   : > { %v1262_v47 = vmax.f32 %v1151_v4, 0.0  ;;  %1475 = vmatprep.mubr.bf16.mxu1 %v1312_v0  ;;  %v1155_v51 = vadd.f32 %v1154_v45, %v3535_v10 }
 0x264   : > { %v1263_v52 = vmax.f32 %v1153_v5, 0.0 }
 0x265   : > { %v1264_v54 = vmax.f32 %v1155_v51, 0.0 }
 0x266   : > { %v1313_v58 = vpack.c.bf16 %v1263_v52, %v1261_v44 }
 0x267   : > { %v1314_v42 = vpack.c.bf16 %v1264_v54, %v1262_v47  ;;  %v1158_v59 = vpop.f32.mrb[96].mxu0 }
 0x268   : > { %v1159_v61 = vadd.f32 %v1158_v59, %v3533_v9  ;;  %v1160_v41 = vpop.f32.mrb[97].mxu0 }
 0x269   : > { %v1161_v62 = vadd.f32 %v1160_v41, %v3535_v10  ;;  %v1162_v46 = vpop.f32.mrb[98].mxu0 }
 0x26a   : > { %1476 = vmatmul.mubr.bf16.gmra.mrb[88].mxu1 %v1311_v37  ;;  %v1265_v63 = vmax.f32 %v1159_v61, 0.0  ;;  %v1163_v43 = vadd.f32 %v1162_v46, %v3533_v9  ;;  %v1164_v2 = vpop.f32.mrb[99].mxu0 }
 0x26b   : > { %v1266_v6 = vmax.f32 %v1161_v62, 0.0  ;;  %1483 = vmatprep.mubr.bf16.mxu1 %v1314_v42  ;;  %v1165_v7 = vadd.f32 %v1164_v2, %v3535_v10 }
 0x26c   : > { %v1267_v8 = vmax.f32 %v1163_v43, 0.0 }
 0x26d   : > { %v1268_v11 = vmax.f32 %v1165_v7, 0.0 }
 0x26e   : > { %v1315_v12 = vpack.c.bf16 %v1267_v8, %v1265_v63 }
 0x26f   : > { %v1316_v13 = vpack.c.bf16 %v1268_v11, %v1266_v6  ;;  %v1168_v14 = vpop.f32.mrb[100].mxu0 }
 0x270   : > { %v1169_v48 = vadd.f32 %v1168_v14, %v3533_v9  ;;  %v1170_v49 = vpop.f32.mrb[101].mxu0 }
 0x271   : > { %v1171_v15 = vadd.f32 %v1170_v49, %v3535_v10  ;;  %v1172_v16 = vpop.f32.mrb[102].mxu0 }
 0x272   : > { %1484 = vmatmul.mubr.bf16.gmra.mrb[92].mxu1 %v1313_v58  ;;  %v1269_v50 = vmax.f32 %v1169_v48, 0.0  ;;  %v1173_v17 = vadd.f32 %v1172_v16, %v3533_v9  ;;  %v1174_v53 = vpop.f32.mrb[103].mxu0 }
 0x273   : > { %v1270_v18 = vmax.f32 %v1171_v15, 0.0  ;;  %1491 = vmatprep.mubr.bf16.mxu1 %v1316_v13  ;;  %v1175_v19 = vadd.f32 %v1174_v53, %v3535_v10 }
 0x274   : > { %v1271_v20 = vmax.f32 %v1173_v17, 0.0 }
 0x275   : > { %v1272_v21 = vmax.f32 %v1175_v19, 0.0 }
 0x276   : > { %v1317_v22 = vpack.c.bf16 %v1271_v20, %v1269_v50 }
 0x277   : > { %v1318_v23 = vpack.c.bf16 %v1272_v21, %v1270_v18  ;;  %v1178_v55 = vpop.f32.mrb[104].mxu0 }
 0x278   : > { %v1179_v24 = vadd.f32 %v1178_v55, %v3533_v9  ;;  %v1180_v25 = vpop.f32.mrb[105].mxu0 }
 0x279   : > { %v1181_v26 = vadd.f32 %v1180_v25, %v3535_v10  ;;  %v1182_v56 = vpop.f32.mrb[106].mxu0 }
 0x27a   : > { %1492 = vmatmul.mubr.bf16.gmra.mrb[96].mxu1 %v1315_v12  ;;  %v1273_v27 = vmax.f32 %v1179_v24, 0.0  ;;  %v1183_v57 = vadd.f32 %v1182_v56, %v3533_v9  ;;  %v1184_v28 = vpop.f32.mrb[107].mxu0 }
 0x27b   : > { %v1274_v29 = vmax.f32 %v1181_v26, 0.0  ;;  %1499 = vmatprep.mubr.bf16.mxu1 %v1318_v23  ;;  %v1185_v60 = vadd.f32 %v1184_v28, %v3535_v10 }
 0x27c   : > { %v1275_v30 = vmax.f32 %v1183_v57, 0.0 }
 0x27d   : > { %v1276_v31 = vmax.f32 %v1185_v60, 0.0 }
 0x27e   : > { %v1319_v32 = vpack.c.bf16 %v1275_v30, %v1273_v27 }
 0x27f   : > { %v1320_v33 = vpack.c.bf16 %v1276_v31, %v1274_v29  ;;  %v1188_v34 = vpop.f32.mrb[108].mxu0 }
 0x280   : > { %v1189_v1 = vadd.f32 %v1188_v34, %v3533_v9  ;;  %v1190_v35 = vpop.f32.mrb[109].mxu0 }
 0x281   : > { %v1191_v36 = vadd.f32 %v1190_v35, %v3535_v10  ;;  %v1192_v37 = vpop.f32.mrb[110].mxu0 }
 0x282   : > { %1500 = vmatmul.mubr.bf16.gmra.mrb[100].mxu1 %v1317_v22  ;;  %v1277_v0 = vmax.f32 %v1189_v1, 0.0  ;;  %v1193_v38 = vadd.f32 %v1192_v37, %v3533_v9  ;;  %v1194_v3 = vpop.f32.mrb[111].mxu0 }
 0x283   : > { %v1278_v39 = vmax.f32 %v1191_v36, 0.0  ;;  %1507 = vmatprep.mubr.bf16.mxu1 %v1320_v33  ;;  %v1195_v4 = vadd.f32 %v1194_v3, %v3535_v10 }
 0x284   : > { %v1279_v40 = vmax.f32 %v1193_v38, 0.0 }
 0x285   : > { %v2695_v44 = vpop.f32.mrb[0].mxu1  ;;  %v1280_v5 = vmax.f32 %v1195_v4, 0.0 }
 0x286   : > { %v1321_v45 = vpack.c.bf16 %v1279_v40, %v1277_v0  ;;  %v2696_v47 = vpop.f32.mrb[1].mxu1 }
 0x287   : > { %v3683_v51 = vadd.f32 %v2696_v47, %v2695_v44  ;;  %v1322_v52 = vpack.c.bf16 %v1280_v5, %v1278_v39  ;;  %v2698_v54 = vpop.f32.mrb[2].mxu1 }
 0x288   : > { %v2699_v58 = vpop.f32.mrb[3].mxu1 }
 0x289   : > { %v3685_v42 = vadd.f32 %v2699_v58, %v2698_v54 }
 0x28a   : > { %1508 = vmatmul.mubr.bf16.gmra.mrb[104].mxu1 %v1319_v32 }
 0x28b   : > { %1515 = vmatprep.mubr.bf16.mxu1 %v1322_v52 }
 0x28d   : > { %v2701_v9 = vpop.f32.mrb[4].mxu1 }
 0x28e   : > { %v2702_v59 = vpop.f32.mrb[5].mxu1 }
 0x28f   : > { %v3687_v61 = vadd.f32 %v2702_v59, %v2701_v9  ;;  %v2704_v41 = vpop.f32.mrb[6].mxu1 }
 0x290   : > { %v2705_v10 = vpop.f32.mrb[7].mxu1 }
 0x291   : > { %v3689_v62 = vadd.f32 %v2705_v10, %v2704_v41  ;;  %v3718_v41 = vld [vmem:[%s4278_s5] ss:$0 sm:$0xff] }
 0x292   : > { %1516 = vmatmul.mubr.bf16.gmra.mrb[108].mxu1 %v1321_v45 }
 0x295   : > { %v2707_v46 = vpop.f32.mrb[8].mxu1 }
 0x296   : > { %v2708_v63 = vpop.f32.mrb[9].mxu1 }
 0x297   : > { %v3691_v43 = vadd.f32 %v2708_v63, %v2707_v46  ;;  %v2710_v2 = vpop.f32.mrb[10].mxu1 }
 0x298   : > { %v2711_v6 = vpop.f32.mrb[11].mxu1 }
 0x299   : > { %v3693_v7 = vadd.f32 %v2711_v6, %v2710_v2 }
 0x29d   : > { %v2713_v8 = vpop.f32.mrb[12].mxu1 }
 0x29e   : > { %v2714_v11 = vpop.f32.mrb[13].mxu1 }
 0x29f   : > { %v3695_v12 = vadd.f32 %v2714_v11, %v2713_v8  ;;  %v2716_v13 = vpop.f32.mrb[14].mxu1 }
 0x2a0   : > { %v2717_v14 = vpop.f32.mrb[15].mxu1 }
 0x2a1   : > { %v3697_v48 = vadd.f32 %v2717_v14, %v2716_v13 }
 0x2a5   : > { %v2719_v49 = vpop.f32.mrb[16].mxu1 }
 0x2a6   : > { %v2720_v15 = vpop.f32.mrb[17].mxu1 }
 0x2a7   : > { %v3699_v16 = vadd.f32 %v2720_v15, %v2719_v49  ;;  %v2722_v50 = vpop.f32.mrb[18].mxu1 }
 0x2a8   : > { %v2723_v17 = vpop.f32.mrb[19].mxu1 }
 0x2a9   : > { %v3701_v53 = vadd.f32 %v2723_v17, %v2722_v50 }
 0x2ad   : > { %v2725_v18 = vpop.f32.mrb[20].mxu1 }
 0x2ae   : > { %v2726_v19 = vpop.f32.mrb[21].mxu1 }
 0x2af   : > { %v3703_v20 = vadd.f32 %v2726_v19, %v2725_v18  ;;  %v2728_v21 = vpop.f32.mrb[22].mxu1 }
 0x2b0   : > { %v2729_v22 = vpop.f32.mrb[23].mxu1 }
 0x2b1   : > { %v3705_v23 = vadd.f32 %v2729_v22, %v2728_v21 }
 0x2b5   : > { %v2731_v55 = vpop.f32.mrb[24].mxu1 }
 0x2b6   : > { %v2732_v24 = vpop.f32.mrb[25].mxu1 }
 0x2b7   : > { %v3707_v25 = vadd.f32 %v2732_v24, %v2731_v55  ;;  %v2734_v26 = vpop.f32.mrb[26].mxu1 }
 0x2b8   : > { %v2735_v56 = vpop.f32.mrb[27].mxu1 }
 0x2b9   : > { %v3709_v27 = vadd.f32 %v2735_v56, %v2734_v26 }
 0x2c5   : > { %v1357_v57 = vpop.f32.mrb[28].mxu1 }
 0x2c6   : > { %v1359_v28 = vpop.f32.mrb[29].mxu1  ;;  %v3721_v46 = vadd.f32 %v3718_v41, %v1357_v57 }
 0x2c7   : > { %v1360_v29 = vpop.f32.mrb[30].mxu1 }
 0x2c8   : > { %v1362_v60 = vpop.f32.mrb[31].mxu1  ;;  %v3727_v8 = vadd.f32 %v3718_v41, %v1360_v29 }
 0x2cd   : > { %v1365_v30 = vpop.f32.mrb[32].mxu1 }
 0x2ce   : > { %v1367_v31 = vpop.f32.mrb[33].mxu1  ;;  %v3737_v50 = vadd.f32 %v3718_v41, %v1365_v30 }
 0x2cf   : > { %v1368_v32 = vpop.f32.mrb[34].mxu1 }
 0x2d0   : > { %v1370_v33 = vpop.f32.mrb[35].mxu1  ;;  %v3743_v21 = vadd.f32 %v3718_v41, %v1368_v32 }
 0x2d5   : > { %v1373_v34 = vpop.f32.mrb[36].mxu1 }
 0x2d6   : > { %v1375_v1 = vpop.f32.mrb[37].mxu1  ;;  %v3753_v57 = vadd.f32 %v3718_v41, %v1373_v34 }
 0x2d7   : > { %v1376_v35 = vpop.f32.mrb[38].mxu1 }
 0x2d8   : > { %v1378_v36 = vpop.f32.mrb[39].mxu1  ;;  %v3759_v30 = vadd.f32 %v3718_v41, %v1376_v35 }
 0x2dd   : > { %v1381_v37 = vpop.f32.mrb[40].mxu1 }
 0x2de   : > { %v1383_v0 = vpop.f32.mrb[41].mxu1  ;;  %v3769_v36 = vadd.f32 %v3718_v41, %v1381_v37 }
 0x2df   : > { %v1384_v38 = vpop.f32.mrb[42].mxu1 }
 0x2e0   : > { %v1386_v3 = vpop.f32.mrb[43].mxu1 }
 0x2e5   : > { %v1389_v39 = vpop.f32.mrb[44].mxu1 }
 0x2e6   : > { %v1391_v4 = vpop.f32.mrb[45].mxu1 }
 0x2e7   : > { %v1392_v40 = vpop.f32.mrb[46].mxu1  ;;  %v3775_v4 = vadd.f32 %v3718_v41, %v1384_v38 }
 0x2e8   : > { %v1394_v44 = vpop.f32.mrb[47].mxu1 }
 0x2ed   : > { %v1397_v5 = vpop.f32.mrb[48].mxu1 }
 0x2ee   : > { %v1399_v45 = vpop.f32.mrb[49].mxu1 }
 0x2ef   : > { %v1400_v47 = vpop.f32.mrb[50].mxu1 }
 0x2f0   : > { %v1402_v52 = vpop.f32.mrb[51].mxu1 }
 0x2f5   : > { %v3711_v54 = vpop.f32.mrb[52].mxu1 }
 0x2f6   : > { %v1407_v58 = vpop.f32.mrb[53].mxu1 }
 0x2f7   : > { %v3713_v9 = vpop.f32.mrb[54].mxu1 }
 0x2f8   : > { %v1410_v59 = vpop.f32.mrb[55].mxu1 }
 0x2f9   : > { %v3785_v59 = vadd.f32 %v3718_v41, %v1389_v39 }
 0x2fd   : > { %v1413_v10 = vpop.f32.mrb[56].mxu1 }
 0x2fe   : > { %v3724_v63 = vadd.f32 %v3718_v41, %v1413_v10  ;;  %v1415_v2 = vpop.f32.mrb[57].mxu1 }
 0x2ff   : > { %v1416_v6 = vpop.f32.mrb[58].mxu1 }
 0x300   : > { %v1524_v11 = vmax.f32 %v3721_v46, %v3724_v63  ;;  %v3732_v13 = vadd.f32 %v3718_v41, %v1416_v6  ;;  %v1418_v14 = vpop.f32.mrb[59].mxu1  ;;  %v3791_v6 = vadd.f32 %v3718_v41, %v1392_v40 }
 0x302   : > { %v1526_v49 = vmax.f32 %v3727_v8, %v3732_v13 }
 0x305   : > { %v1421_v15 = vpop.f32.mrb[60].mxu1 }
 0x306   : > { %v3740_v17 = vadd.f32 %v3718_v41, %v1421_v15  ;;  %v1423_v18 = vpop.f32.mrb[61].mxu1 }
 0x307   : > { %v1424_v19 = vpop.f32.mrb[62].mxu1 }
 0x308   : > { %v1528_v22 = vmax.f32 %v3737_v50, %v3740_v17  ;;  %v3748_v55 = vadd.f32 %v3718_v41, %v1424_v19  ;;  %v1426_v24 = vpop.f32.mrb[63].mxu1 }
 0x309   : > { %v3801_v24 = vadd.f32 %v3718_v41, %v1397_v5 }
 0x30a   : > { %v1530_v26 = vmax.f32 %v3743_v21, %v3748_v55 }
 0x30d   : > { %v1429_v56 = vpop.f32.mrb[64].mxu1 }
 0x30e   : > { %v3756_v28 = vadd.f32 %v3718_v41, %v1429_v56  ;;  %v1431_v29 = vpop.f32.mrb[65].mxu1 }
 0x30f   : > { %v1432_v60 = vpop.f32.mrb[66].mxu1 }
 0x310   : > { %v3764_v32 = vadd.f32 %v3718_v41, %v1432_v60  ;;  %v1434_v33 = vpop.f32.mrb[67].mxu1  ;;  %v3807_v60 = vadd.f32 %v3718_v41, %v1400_v47 }
 0x315   : > { %v1437_v34 = vpop.f32.mrb[68].mxu1 }
 0x316   : > { %v3772_v0 = vadd.f32 %v3718_v41, %v1437_v34  ;;  %v1439_v3 = vpop.f32.mrb[69].mxu1 }
 0x317   : > { %v1440_v35 = vpop.f32.mrb[70].mxu1 }
 0x318   : > { %v3780_v45 = vadd.f32 %v3718_v41, %v1440_v35  ;;  %v1442_v52 = vpop.f32.mrb[71].mxu1  ;;  %v837_v35 = vadd.f32 %v3683_v51, %v3718_v41 }
 0x319   : > { %v3818_v52 = vadd.f32 %v3718_v41, %v3711_v54 }
 0x31d   : > { %v1445_v37 = vpop.f32.mrb[72].mxu1 }
 0x31e   : > { %v3788_v10 = vadd.f32 %v3718_v41, %v1445_v37  ;;  %v1447_v2 = vpop.f32.mrb[73].mxu1 }
 0x31f   : > { %v1448_v38 = vpop.f32.mrb[74].mxu1 }
 0x320   : > { %v3796_v15 = vadd.f32 %v3718_v41, %v1448_v38  ;;  %v1450_v18 = vpop.f32.mrb[75].mxu1  ;;  %v3825_v38 = vadd.f32 %v3718_v41, %v3713_v9 }
 0x325   : > { %v1453_v39 = vpop.f32.mrb[76].mxu1 }
 0x326   : > { %v3804_v56 = vadd.f32 %v3718_v41, %v1453_v39  ;;  %v1455_v29 = vpop.f32.mrb[77].mxu1 }
 0x327   : > { %v1456_v40 = vpop.f32.mrb[78].mxu1 }
 0x328   : > { %v3812_v34 = vadd.f32 %v3718_v41, %v1456_v40  ;;  %v1458_v3 = vpop.f32.mrb[79].mxu1 }
 0x32d   : > { %v1461_v5 = vpop.f32.mrb[80].mxu1 }
 0x32e   : > { %v3821_v37 = vadd.f32 %v3718_v41, %v1461_v5  ;;  %v1463_v47 = vpop.f32.mrb[81].mxu1 }
 0x32f   : > { %v1464_v2 = vpop.f32.mrb[82].mxu1 }
 0x330   : > { %v3830_v39 = vadd.f32 %v3718_v41, %v1464_v2  ;;  %v1466_v29 = vpop.f32.mrb[83].mxu1 }
 0x335   : > { %v1469_v40 = vpop.f32.mrb[84].mxu1 }
 0x336   : > { %v1470_v3 = vadd.f32 %v3718_v41, %v1469_v40  ;;  %v1471_v5 = vpop.f32.mrb[85].mxu1  ;;  %v840_v40 = vadd.f32 %v3685_v42, %v3718_v41  ;;  %v845_v42 = vadd.f32 %v3687_v61, %v3718_v41 }
 0x337   : > { %v1472_v47 = vpop.f32.mrb[86].mxu1 }
 0x338   : > { %v1525_v9 = vmax.f32 %v1524_v11, %v1470_v3  ;;  %v1473_v18 = vadd.f32 %v3718_v41, %v1472_v47  ;;  %v1474_v2 = vpop.f32.mrb[87].mxu1 }
 0x33a   : > { %v1552_v33 = vmax.f32 %v837_v35, %v1525_v9  ;;  %v1527_v29 = vmax.f32 %v1526_v49, %v1473_v18 }
 0x33c   : > { %v1566_v5 = vsub.f32 %v837_v35, %v1552_v33  ;;  %v1608_v54 = vsub.f32 %v3721_v46, %v1552_v33  ;;  %v1622_v51 = vsub.f32 %v3724_v63, %v1552_v33  ;;  %v1636_v19 = vsub.f32 %v1470_v3, %v1552_v33 }
 0x33d   : > { %v1553_v14 = vmax.f32 %v840_v40, %v1527_v29  ;;  %v1477_v58 = vpop.f32.mrb[88].mxu1 }
 0x33e   : > { %v1650_v11 = vmul.f32 1.442695, %v1608_v54  ;;  %v1678_v44 = vmul.f32 1.442695, %v1622_v51  ;;  %v1478_v47 = vadd.f32 %v3718_v41, %v1477_v58  ;;  %v1580_v9 = vmul.f32 1.442695, %v1566_v5 }
 0x33f   : > { %v1567_v2 = vsub.f32 %v840_v40, %v1553_v14  ;;  %v1609_v1 = vsub.f32 %v3727_v8, %v1553_v14  ;;  %v1623_v49 = vsub.f32 %v3732_v13, %v1553_v14  ;;  %v1479_v31 = vpop.f32.mrb[89].mxu1  ;;  %v1706_v46 = vmul.f32 1.442695, %v1636_v19 }
 0x340   : > { %v1637_v35 = vsub.f32 %v1473_v18, %v1553_v14  ;;  %v1529_v63 = vmax.f32 %v1528_v22, %v1478_v47  ;;  %v1480_v33 = vpop.f32.mrb[90].mxu1  ;;  %2861 = vpow2.f32 %v1650_v11  ;;  %v848_v22 = vadd.f32 %v3689_v62, %v3718_v41 }
 0x341   : > { %v1652_v54 = vmul.f32 1.442695, %v1609_v1  ;;  %2863 = vpow2.f32 %v1678_v44  ;;  %v1680_v58 = vmul.f32 1.442695, %v1623_v49  ;;  %v1481_v8 = vadd.f32 %v3718_v41, %v1480_v33  ;;  %v1482_v29 = vpop.f32.mrb[91].mxu1 }
 0x342   : > { %v1554_v3 = vmax.f32 %v845_v42, %v1529_v63  ;;  %2865 = vpow2.f32 %v1580_v9  ;;  %v1582_v13 = vmul.f32 1.442695, %v1567_v2  ;;  %v1708_v31 = vmul.f32 1.442695, %v1637_v35 }
 0x343   : > { %2867 = vpow2.f32 %v1706_v46  ;;  %v1531_v44 = vmax.f32 %v1530_v26, %v1481_v8  ;;  %v4305_v35 = vmax.f32 %v3753_v57, %v3756_v28 }
 0x344   : > { %v1568_v61 = vsub.f32 %v845_v42, %v1554_v3  ;;  %v1610_v14 = vsub.f32 %v3737_v50, %v1554_v3  ;;  %v1624_v19 = vsub.f32 %v3740_v17, %v1554_v3  ;;  %2869 = vpow2.f32 %v1652_v54 }
 0x345   : > { %v1638_v1 = vsub.f32 %v1478_v47, %v1554_v3  ;;  %v1485_v18 = vpop.f32.mrb[92].mxu1  ;;  %2871 = vpow2.f32 %v1680_v58  ;;  %v1555_v11 = vmax.f32 %v848_v22, %v1531_v44  ;;  %v853_v17 = vadd.f32 %v3691_v43, %v3718_v41 }
 0x346   : > { %v1654_v40 = vmul.f32 1.442695, %v1610_v14  ;;  %v1682_v5 = vmul.f32 1.442695, %v1624_v19  ;;  %2873 = vpow2.f32 %v1582_v13  ;;  %v1584_v51 = vmul.f32 1.442695, %v1568_v61 }
 0x347   : > { %v1486_v50 = vadd.f32 %v3718_v41, %v1485_v18  ;;  %v1487_v9 = vpop.f32.mrb[93].mxu1  ;;  %2875 = vpow2.f32 %v1708_v31  ;;  %v1710_v62 = vmul.f32 1.442695, %v1638_v1  ;;  %v1569_v2 = vsub.f32 %v848_v22, %v1555_v11 }
 0x348   : > { %v1488_v47 = vpop.f32.mrb[94].mxu1  ;;  %2877 = vpow2.f32 %v1654_v40  ;;  %v1611_v26 = vsub.f32 %v3743_v21, %v1555_v11  ;;  %v1625_v49 = vsub.f32 %v3748_v55, %v1555_v11  ;;  %v1639_v46 = vsub.f32 %v1481_v8, %v1555_v11 }
 0x349   : > { %v1490_v42 = vpop.f32.mrb[95].mxu1  ;;  %2879 = vpow2.f32 %v1682_v5  ;;  %v1533_v63 = vmax.f32 %v4305_v35, %v1486_v50  ;;  %v3873_v33 = vadd.f32 %v3718_v41, %v1488_v47  ;;  %v1586_v54 = vmul.f32 1.442695, %v1569_v2 }
 0x34a   : > { %v3875_v43 = vpop.eup %2861  ;;  %2881 = vpow2.f32 %v1584_v51  ;;  %v1656_v58 = vmul.f32 1.442695, %v1611_v26  ;;  %v1684_v3 = vmul.f32 1.442695, %v1625_v49  ;;  %v1712_v21 = vmul.f32 1.442695, %v1639_v46 }
 0x34b   : > { %v3877_v29 = vpop.eup %2863  ;;  %2883 = vpow2.f32 %v1710_v62  ;;  %v1556_v55 = vmax.f32 %v853_v17, %v1533_v63  ;;  %v4306_v8 = vmax.f32 %v3759_v30, %v3764_v32  ;;  %v856_v61 = vadd.f32 %v3693_v7, %v3718_v41 }
 0x34c   : > { %v3883_v31 = vpop.eup %2865  ;;  %v3889_v14 = vadd.f32 %v3695_v12, %v3718_v41  ;;  %v1734_v19 = vadd.f32 %v3877_v29, %v3875_v43  ;;  %2885 = vpow2.f32 %v1586_v54 }
 0x34d   : > { %v1535_v13 = vmax.f32 %v4306_v8, %v3873_v33  ;;  %v1493_v22 = vpop.f32.mrb[96].mxu1  ;;  %v3893_v1 = vpop.eup %2867  ;;  %2887 = vpow2.f32 %v1656_v58  ;;  %v1570_v44 = vsub.f32 %v853_v17, %v1556_v55  ;;  %v1612_v18 = vsub.f32 %v3753_v57, %v1556_v55 }
 0x34e   : > { %v1626_v40 = vsub.f32 %v3756_v28, %v1556_v55  ;;  %v1495_v5 = vpop.f32.mrb[97].mxu1  ;;  %v3897_v51 = vpop.eup %2869  ;;  %v1735_v7 = vadd.f32 %v3893_v1, %v1734_v19  ;;  %2889 = vpow2.f32 %v1684_v3  ;;  %v1640_v12 = vsub.f32 %v1486_v50, %v1556_v55 }
 0x34f   : > { %v1557_v11 = vmax.f32 %v856_v61, %v1535_v13  ;;  %v1496_v9 = vpop.f32.mrb[98].mxu1  ;;  %v3900_v62 = vpop.eup %2871  ;;  %2891 = vpow2.f32 %v1712_v21  ;;  %v1588_v47 = vmul.f32 1.442695, %v1570_v44  ;;  %v1658_v2 = vmul.f32 1.442695, %v1612_v18 }
 0x350   : > { %v1686_v26 = vmul.f32 1.442695, %v1626_v40  ;;  %v3902_v17 = vpop.eup %2873  ;;  %v1762_v57 = vadd.f32 %v3883_v31, %v1735_v7  ;;  %v1736_v28 = vadd.f32 %v3900_v62, %v3897_v51  ;;  %v1714_v49 = vmul.f32 1.442695, %v1640_v12  ;;  %v1498_v46 = vpop.f32.mrb[99].mxu1 }
 0x351   : > { %v1571_v42 = vsub.f32 %v856_v61, %v1557_v11  ;;  %v3907_v35 = vpop.eup %2875  ;;  %2893 = vpow2.f32 %v1588_v47  ;;  %v1613_v50 = vsub.f32 %v3759_v30, %v1557_v11  ;;  %v1627_v63 = vsub.f32 %v3764_v32, %v1557_v11 }
 0x352   : > { %v1641_v54 = vsub.f32 %v3873_v33, %v1557_v11  ;;  %v3912_v58 = vpop.eup %2877  ;;  %v3916_v3 = vadd.f32 %v3697_v48, %v3718_v41  ;;  %2895 = vrcp.f32 %v1762_v57  ;;  %v1737_v21 = vadd.f32 %v3907_v35, %v1736_v28 }
 0x353   : > { %v3920_v55 = vadd.f32 %v3718_v41, %v1493_v22  ;;  %v3922_v8 = vpop.eup %2879  ;;  %v3926_v30 = vadd.f32 %v3699_v16, %v3718_v41  ;;  %2897 = vpow2.f32 %v1658_v2  ;;  %v1590_v32 = vmul.f32 1.442695, %v1571_v42 }
 0x354   : > { %v1660_v33 = vmul.f32 1.442695, %v1613_v50  ;;  %v3928_v13 = vpop.eup %2881  ;;  %v1763_v48 = vadd.f32 %v3902_v17, %v1737_v21  ;;  %v1738_v61 = vadd.f32 %v3922_v8, %v3912_v58  ;;  %2899 = vpow2.f32 %v1686_v26 }
 0x355   : > { %v4307_v19 = vmax.f32 %v3769_v36, %v3772_v0  ;;  %v1501_v44 = vpop.f32.mrb[100].mxu1  ;;  %v3937_v18 = vpop.eup %2883  ;;  %2901 = vpow2.f32 %v1714_v49  ;;  %v1688_v16 = vmul.f32 1.442695, %v1627_v63  ;;  %v3940_v40 = vadd.f32 %v3718_v41, %v1496_v9 }
 0x356   : > { %v3943_v5 = vadd.f32 %v3718_v41, %v1501_v44  ;;  %v1503_v7 = vpop.f32.mrb[101].mxu1  ;;  %v3945_v12 = vpop.eup %2885  ;;  %v3949_v11 = vadd.f32 %v3701_v53, %v3718_v41  ;;  %2903 = vrcp.f32 %v1763_v48  ;;  %v1739_v47 = vadd.f32 %v3937_v18, %v1738_v61 }
 0x357   : > { %v1537_v22 = vmax.f32 %v4307_v19, %v3920_v55  ;;  %v1504_v26 = vpop.f32.mrb[102].mxu1  ;;  %v3953_v57 = vpop.eup %2887  ;;  %2905 = vpow2.f32 %v1590_v32  ;;  %v1716_v9 = vmul.f32 1.442695, %v1641_v54  ;;  %v4308_v28 = vmax.f32 %v3775_v4, %v3780_v45 }
 0x358   : > { %v4309_v53 = vmax.f32 %v3785_v59, %v3788_v10  ;;  %v1506_v46 = vpop.f32.mrb[103].mxu1  ;;  %v3963_v50 = vpop.eup %2889  ;;  %v1764_v63 = vadd.f32 %v3928_v13, %v1739_v47  ;;  %2907 = vpow2.f32 %v1660_v33  ;;  %v3979_v47 = vadd.f32 %v3718_v41, %v1504_v26 }
 0x359   : > { %v1558_v2 = vmax.f32 %v3889_v14, %v1537_v22  ;;  %v1539_v49 = vmax.f32 %v4308_v28, %v3940_v40  ;;  %v3968_v32 = vpop.eup %2891  ;;  %v1740_v48 = vadd.f32 %v3963_v50, %v3953_v57  ;;  %2909 = vpow2.f32 %v1688_v16 }
 0x35a   : > { %v1541_v42 = vmax.f32 %v4309_v53, %v3943_v5  ;;  %2911 = vrcp.f32 %v1764_v63 }
 0x35b   : > { %v1572_v21 = vsub.f32 %v3889_v14, %v1558_v2  ;;  %v1614_v54 = vsub.f32 %v3769_v36, %v1558_v2  ;;  %v1628_v61 = vsub.f32 %v3772_v0, %v1558_v2  ;;  %v1642_v19 = vsub.f32 %v3920_v55, %v1558_v2  ;;  %v3975_v33 = vpop.eup %2893 }
 0x35c   : > { %v1559_v7 = vmax.f32 %v3916_v3, %v1539_v49  ;;  %v1741_v14 = vadd.f32 %v3968_v32, %v1740_v48  ;;  %2913 = vpow2.f32 %v1716_v9  ;;  %v2896_v16 = vpop.eup %2895 }
 0x35d   : > { %v1592_v22 = vmul.f32 1.442695, %v1572_v21  ;;  %v1662_v44 = vmul.f32 1.442695, %v1614_v54  ;;  %v1690_v36 = vmul.f32 1.442695, %v1628_v61  ;;  %v3986_v49 = vpop.eup %2897  ;;  %v1790_v53 = vmul.f32 %v2896_v16, %v3883_v31 }
 0x35e   : > { %v1573_v0 = vsub.f32 %v3916_v3, %v1559_v7  ;;  %v1615_v55 = vsub.f32 %v3775_v4, %v1559_v7  ;;  %v1629_v2 = vsub.f32 %v3780_v45, %v1559_v7  ;;  %v3984_v28 = vpop.f32.mrb[104].mxu1  ;;  %v1874_v9 = vmul.f32 %v2896_v16, %v3875_v43  ;;  %v3992_v21 = vpop.eup %2899 }
 0x35f   : > { %2915 = vpow2.f32 %v1592_v22  ;;  %v1888_v46 = vmul.f32 %v2896_v16, %v3877_v29  ;;  %v1902_v26 = vmul.f32 %v2896_v16, %v3893_v1  ;;  %v1511_v63 = vpop.f32.mrb[105].mxu1  ;;  %v1765_v4 = vadd.f32 %v3945_v12, %v1741_v14  ;;  %v3999_v48 = vpop.eup %2901 }
 0x360   : > { %2917 = vpow2.f32 %v1662_v44  ;;  %v1718_v45 = vmul.f32 1.442695, %v1642_v19  ;;  %v1643_v3 = vsub.f32 %v3940_v40, %v1559_v7  ;;  %v3997_v54 = vpop.f32.mrb[106].mxu1  ;;  %v1742_v43 = vadd.f32 %v3992_v21, %v3986_v49  ;;  %v2904_v61 = vpop.eup %2903 }
 0x361   : > { %2919 = vpow2.f32 %v1690_v36  ;;  %v1594_v29 = vmul.f32 1.442695, %v1573_v0  ;;  %v1664_v31 = vmul.f32 1.442695, %v1615_v55  ;;  %v1514_v1 = vpop.f32.mrb[107].mxu1  ;;  %v4004_v14 = vmax.f32 %v3926_v30, %v1541_v42  ;;  %v4010_v44 = vpop.eup %2905 }
 0x362   : > { %2921 = vrcp.f32 %v1765_v4  ;;  %v1692_v22 = vmul.f32 1.442695, %v1629_v2  ;;  %v4310_v40 = vmax.f32 %v3791_v6, %v3796_v15  ;;  %v1791_v7 = vmul.f32 %v2904_v61, %v3902_v17  ;;  %v4016_v55 = vpop.eup %2907 }
 0x363   : > { %v1875_v36 = vmul.f32 %v2904_v61, %v3897_v51  ;;  %v1889_v16 = vmul.f32 %v2904_v61, %v3900_v62  ;;  %v1903_v0 = vmul.f32 %v2904_v61, %v3907_v35  ;;  %v1743_v42 = vadd.f32 %v3999_v48, %v1742_v43  ;;  %v4023_v4 = vpop.eup %2909 }
 0x364   : > { %v1543_v19 = vmax.f32 %v4310_v40, %v3979_v47  ;;  %2923 = vpow2.f32 %v1718_v45  ;;  %v1574_v2 = vsub.f32 %v3926_v30, %v4004_v14  ;;  %v1616_v63 = vsub.f32 %v3785_v59, %v4004_v14  ;;  %v2912_v40 = vpop.eup %2911 }
 0x365   : > { %v2515_v17 = vpack.c.bf16 %v1791_v7, %v1790_v53  ;;  %v2550_v51 = vpack.c.bf16 %v1875_v36, %v1874_v9  ;;  %v2585_v1 = vpack.c.bf16 %v1889_v16, %v1888_v46  ;;  %v2620_v62 = vpack.c.bf16 %v1903_v0, %v1902_v26  ;;  %v4028_v61 = vpop.f32.mrb[108].mxu1 }
 0x366   : > { %v1766_v35 = vadd.f32 %v3975_v33, %v1743_v42  ;;  %v1744_v43 = vadd.f32 %v4023_v4, %v4016_v55  ;;  %2925 = vpow2.f32 %v1594_v29  ;;  %v1720_v45 = vmul.f32 1.442695, %v1643_v3  ;;  %v4030_v30 = vpop.eup %2913  ;;  %v1519_v26 = vpop.f32.mrb[109].mxu1 }
 0x367   : > { %2516 = vst [vmem:[%s4034_s18] sm:$0xff] %v2515_v17   ;;  %2658 = vst [vmem:[%s4034_s18 + $0x38] sm:$0xff] %v2550_v51   ;;  %v1792_v59 = vmul.f32 %v2912_v40, %v3928_v13  ;;  %v1876_v53 = vmul.f32 %v2912_v40, %v3912_v58  ;;  %v1890_v9 = vmul.f32 %v2912_v40, %v3922_v8  ;;  %v4051_v16 = vpop.f32.mrb[110].mxu1  ;;  %v1596_v58 = vmul.f32 1.442695, %v1574_v2 }
 0x368   : > { %2665 = vst [vmem:[%s4034_s18 + $0x70] sm:$0xff] %v2585_v1   ;;  %2672 = vst [vmem:[%s4034_s18 + $0xa8] sm:$0xff] %v2620_v62   ;;  %v1904_v46 = vmul.f32 %v2912_v40, %v3937_v18  ;;  %2927 = vrcp.f32 %v1766_v35  ;;  %v1745_v29 = vadd.f32 %v4030_v30, %v1744_v43  ;;  %v1630_v7 = vsub.f32 %v3788_v10, %v4004_v14  ;;  %v1522_v18 = vpop.f32.mrb[111].mxu1 }
 0x369   : > { %v4044_v3 = vpop.eup %2915  ;;  %v1644_v36 = vsub.f32 %v3943_v5, %v4004_v14  ;;  %2929 = vpow2.f32 %v1664_v31  ;;  %v1561_v8 = vmax.f32 %v3949_v11, %v1543_v19  ;;  %v4056_v13 = vadd.f32 %v3718_v41, %v3984_v28 }
 0x36a   : > { %v4058_v0 = vpop.eup %2917  ;;  %v1767_v42 = vadd.f32 %v4010_v44, %v1745_v29  ;;  %2931 = vpow2.f32 %v1692_v22  ;;  %v1666_v10 = vmul.f32 1.442695, %v1616_v63  ;;  %v1694_v17 = vmul.f32 1.442695, %v1630_v7 }
 0x36b   : > { %v4061_v51 = vpop.eup %2919  ;;  %2933 = vpow2.f32 %v1720_v45  ;;  %v1575_v5 = vsub.f32 %v3949_v11, %v1561_v8  ;;  %v1617_v31 = vsub.f32 %v3791_v6, %v1561_v8  ;;  %v1631_v14 = vsub.f32 %v3796_v15, %v1561_v8 }
 0x36c   : > { %v2922_v19 = vpop.eup %2921  ;;  %2935 = vrcp.f32 %v1767_v42  ;;  %v1746_v28 = vadd.f32 %v4061_v51, %v4058_v0  ;;  %v1645_v2 = vsub.f32 %v3979_v47, %v1561_v8  ;;  %v4311_v22 = vmax.f32 %v3801_v24, %v3804_v56 }
 0x36d   : > { %v1793_v1 = vmul.f32 %v2922_v19, %v3945_v12  ;;  %v1877_v11 = vmul.f32 %v2922_v19, %v3953_v57  ;;  %v1891_v6 = vmul.f32 %v2922_v19, %v3963_v50  ;;  %v1905_v15 = vmul.f32 %v2922_v19, %v3968_v32 }
 0x36e   : > { %v1545_v63 = vmax.f32 %v4311_v22, %v4056_v13  ;;  %v4077_v62 = vpop.eup %2923  ;;  %v4081_v47 = vadd.f32 %v3703_v20, %v3718_v41  ;;  %v4085_v40 = vadd.f32 %v3705_v23, %v3718_v41  ;;  %2937 = vpow2.f32 %v1596_v58 }
 0x36f   : > { %v1722_v12 = vmul.f32 1.442695, %v1644_v36  ;;  %v2520_v57 = vpack.c.bf16 %v1793_v1, %v1792_v59  ;;  %v2555_v50 = vpack.c.bf16 %v1877_v11, %v1876_v53  ;;  %v2590_v35 = vpack.c.bf16 %v1891_v6, %v1890_v9 }
 0x370   : > { %v2625_v43 = vpack.c.bf16 %v1905_v15, %v1904_v46  ;;  %v4087_v32 = vpop.eup %2925  ;;  %v4091_v45 = vadd.f32 %v3707_v25, %v3718_v41  ;;  %v1747_v20 = vadd.f32 %v4077_v62, %v1746_v28  ;;  %2939 = vpow2.f32 %v1666_v10 }
 0x371   : > { %v4095_v26 = vmax.f32 %v4081_v47, %v1545_v63  ;;  %2652 = vst [vmem:[%s4034_s18 + $0x8] sm:$0xff] %v2520_v57   ;;  %2659 = vst [vmem:[%s4034_s18 + $0x40] sm:$0xff] %v2555_v50   ;;  %2941 = vpow2.f32 %v1694_v17  ;;  %v1668_v23 = vmul.f32 1.442695, %v1617_v31  ;;  %v4103_v59 = vadd.f32 %v3718_v41, %v3997_v54 }
 0x372   : > { %2666 = vst [vmem:[%s4034_s18 + $0x78] sm:$0xff] %v2590_v35   ;;  %2673 = vst [vmem:[%s4034_s18 + $0xb0] sm:$0xff] %v2625_v43   ;;  %v4107_v25 = vadd.f32 %v3718_v41, %v4028_v61  ;;  %v2928_v53 = vpop.eup %2927  ;;  %v1768_v9 = vadd.f32 %v4044_v3, %v1747_v20  ;;  %2943 = vpow2.f32 %v1722_v12  ;;  %v1696_v18 = vmul.f32 1.442695, %v1631_v14 }
 0x373   : > { %v1576_v46 = vsub.f32 %v4081_v47, %v4095_v26  ;;  %v1618_v29 = vsub.f32 %v3801_v24, %v4095_v26  ;;  %v4114_v7 = vpop.eup %2929  ;;  %v1794_v36 = vmul.f32 %v2928_v53, %v3975_v33  ;;  %v1878_v54 = vmul.f32 %v2928_v53, %v3986_v49 }
 0x374   : > { %v1892_v58 = vmul.f32 %v2928_v53, %v3992_v21  ;;  %v1906_v61 = vmul.f32 %v2928_v53, %v3999_v48  ;;  %v4120_v8 = vpop.eup %2931  ;;  %2945 = vrcp.f32 %v1768_v9  ;;  %v1632_v42 = vsub.f32 %v3804_v56, %v4095_v26 }
 0x375   : > { %v1646_v24 = vsub.f32 %v4056_v13, %v4095_v26  ;;  %v4126_v10 = vpop.eup %2933  ;;  %v1748_v33 = vadd.f32 %v4120_v8, %v4114_v7  ;;  %v1598_v49 = vmul.f32 1.442695, %v1575_v5  ;;  %v1724_v17 = vmul.f32 1.442695, %v1645_v2 }
 0x376   : > { %v4312_v21 = vmax.f32 %v3807_v60, %v3812_v34  ;;  %v2936_v31 = vpop.eup %2935  ;;  %2947 = vpow2.f32 %v1668_v23  ;;  %v1670_v14 = vmul.f32 1.442695, %v1618_v29  ;;  %v1698_v19 = vmul.f32 1.442695, %v1632_v42 }
 0x377   : > { %v4313_v56 = vmax.f32 %v3818_v52, %v3821_v37  ;;  %v1795_v28 = vmul.f32 %v2936_v31, %v4010_v44  ;;  %v1879_v22 = vmul.f32 %v2936_v31, %v4016_v55  ;;  %v1893_v5 = vmul.f32 %v2936_v31, %v4023_v4 }
 0x378   : > { %v1547_v48 = vmax.f32 %v4312_v21, %v4103_v59  ;;  %v1907_v2 = vmul.f32 %v2936_v31, %v4030_v30  ;;  %v4142_v63 = vpop.eup %2937  ;;  %v1749_v1 = vadd.f32 %v4126_v10, %v1748_v33  ;;  %2949 = vpow2.f32 %v1696_v18 }
 0x379   : > { %v1549_v13 = vmax.f32 %v4313_v56, %v4107_v25  ;;  %v2525_v44 = vpack.c.bf16 %v1795_v28, %v1794_v36  ;;  %v2560_v55 = vpack.c.bf16 %v1879_v22, %v1878_v54  ;;  %v2595_v15 = vpack.c.bf16 %v1893_v5, %v1892_v58 }
 0x37a   : > { %v1563_v11 = vmax.f32 %v4085_v40, %v1547_v48  ;;  %v2630_v4 = vpack.c.bf16 %v1907_v2, %v1906_v61  ;;  %v4149_v47 = vpop.eup %2939  ;;  %v1769_v30 = vadd.f32 %v4087_v32, %v1749_v1  ;;  %2951 = vpow2.f32 %v1724_v17 }
 0x37b   : > { %v4147_v6 = vmax.f32 %v4091_v45, %v1549_v13  ;;  %v4154_v50 = vpop.eup %2941  ;;  %2653 = vst [vmem:[%s4034_s18 + $0x10] sm:$0xff] %v2525_v44   ;;  %2660 = vst [vmem:[%s4034_s18 + $0x48] sm:$0xff] %v2560_v55   ;;  %2953 = vpow2.f32 %v1598_v49  ;;  %v1726_v23 = vmul.f32 1.442695, %v1646_v24  ;;  %v4170_v9 = vadd.f32 %v3718_v41, %v4051_v16 }
 0x37c   : > { %v1577_v12 = vsub.f32 %v4085_v40, %v1563_v11  ;;  %v1619_v57 = vsub.f32 %v3807_v60, %v1563_v11  ;;  %2667 = vst [vmem:[%s4034_s18 + $0x80] sm:$0xff] %v2595_v15   ;;  %2674 = vst [vmem:[%s4034_s18 + $0xb8] sm:$0xff] %v2630_v4   ;;  %v1633_v35 = vsub.f32 %v3812_v34, %v1563_v11  ;;  %v4164_v26 = vpop.eup %2943  ;;  %2955 = vrcp.f32 %v1769_v30 }
 0x37d   : > { %v1647_v43 = vsub.f32 %v4103_v59, %v1563_v11  ;;  %v1578_v20 = vsub.f32 %v4091_v45, %v4147_v6  ;;  %v1750_v60 = vadd.f32 %v4154_v50, %v4149_v47  ;;  %v1600_v40 = vmul.f32 1.442695, %v1576_v46 }
 0x37e   : > { %2957 = vpow2.f32 %v1670_v14  ;;  %v1672_v53 = vmul.f32 1.442695, %v1619_v57  ;;  %v2946_v34 = vpop.eup %2945  ;;  %v1620_v45 = vsub.f32 %v3818_v52, %v4147_v6  ;;  %v1634_v29 = vsub.f32 %v3821_v37, %v4147_v6 }
 0x37f   : > { %v1751_v59 = vadd.f32 %v4164_v26, %v1750_v60  ;;  %2959 = vpow2.f32 %v1698_v19  ;;  %v1796_v36 = vmul.f32 %v2946_v34, %v4044_v3  ;;  %v1880_v46 = vmul.f32 %v2946_v34, %v4058_v0 }
 0x380   : > { %v1894_v54 = vmul.f32 %v2946_v34, %v4061_v51  ;;  %v1908_v58 = vmul.f32 %v2946_v34, %v4077_v62  ;;  %v4181_v16 = vpop.eup %2947  ;;  %2961 = vpow2.f32 %v1600_v40  ;;  %v1700_v18 = vmul.f32 1.442695, %v1633_v35 }
 0x381   : > { %v1770_v61 = vadd.f32 %v4142_v63, %v1751_v59  ;;  %v1648_v52 = vsub.f32 %v4107_v25, %v4147_v6  ;;  %v4188_v37 = vadd.f32 %v3709_v27, %v3718_v41  ;;  %2963 = vpow2.f32 %v1726_v23 }
 0x382   : > { %v1602_v3 = vmul.f32 1.442695, %v1577_v12  ;;  %v4314_v0 = vmax.f32 %v3825_v38, %v3830_v39  ;;  %v4194_v62 = vpop.eup %2949  ;;  %v1728_v42 = vmul.f32 1.442695, %v1647_v43  ;;  %v1674_v27 = vmul.f32 1.442695, %v1620_v45 }
 0x383   : > { %2965 = vrcp.f32 %v1770_v61  ;;  %v1752_v24 = vadd.f32 %v4194_v62, %v4181_v16  ;;  %v1702_v31 = vmul.f32 1.442695, %v1634_v29 }
 0x384   : > { %v1551_v51 = vmax.f32 %v4314_v0, %v4170_v9  ;;  %2967 = vpow2.f32 %v1672_v53  ;;  %v4199_v33 = vpop.eup %2951 }
 0x385   : > { %2969 = vpow2.f32 %v1700_v18  ;;  %v2954_v41 = vpop.eup %2953  ;;  %v1753_v49 = vadd.f32 %v4199_v33, %v1752_v24 }
 0x386   : > { %v1565_v25 = vmax.f32 %v4188_v37, %v1551_v51  ;;  %2971 = vpow2.f32 %v1602_v3  ;;  %v2956_v48 = vpop.eup %2955 }
 0x387   : > { %2973 = vpow2.f32 %v1728_v42  ;;  %v1797_v13 = vmul.f32 %v2956_v48, %v4087_v32  ;;  %v1881_v28 = vmul.f32 %v2956_v48, %v4114_v7  ;;  %v1895_v22 = vmul.f32 %v2956_v48, %v4120_v8 }
 0x388   : > { %v1579_v17 = vsub.f32 %v4188_v37, %v1565_v25  ;;  %v1621_v21 = vsub.f32 %v3825_v38, %v1565_v25  ;;  %v1635_v14 = vsub.f32 %v3830_v39, %v1565_v25  ;;  %v1649_v19 = vsub.f32 %v4170_v9, %v1565_v25  ;;  %v4206_v56 = vpop.eup %2957 }
 0x389   : > { %v1909_v5 = vmul.f32 %v2956_v48, %v4126_v10  ;;  %v4212_v38 = vpop.eup %2959  ;;  %v1771_v2 = vadd.f32 %v2954_v41, %v1753_v49  ;;  %2975 = vpow2.f32 %v1674_v27  ;;  %v1730_v39 = vmul.f32 1.442695, %v1648_v52 }
 0x38a   : > { %v2530_v1 = vpack.c.bf16 %v1797_v13, %v1796_v36  ;;  %v2565_v11 = vpack.c.bf16 %v1881_v28, %v1880_v46  ;;  %v2600_v6 = vpack.c.bf16 %v1895_v22, %v1894_v54  ;;  %v2962_v32 = vpop.eup %2961  ;;  %v1754_v7 = vadd.f32 %v4212_v38, %v4206_v56 }
 0x38b   : > { %v2635_v44 = vpack.c.bf16 %v1909_v5, %v1908_v58  ;;  %2977 = vrcp.f32 %v1771_v2  ;;  %v1604_v8 = vmul.f32 1.442695, %v1578_v20  ;;  %v2964_v55 = vpop.eup %2963  ;;  %v1676_v10 = vmul.f32 1.442695, %v1621_v21 }
 0x38c   : > { %2654 = vst [vmem:[%s4034_s18 + $0x18] sm:$0xff] %v2530_v1   ;;  %2661 = vst [vmem:[%s4034_s18 + $0x50] sm:$0xff] %v2565_v11   ;;  %2979 = vpow2.f32 %v1702_v31  ;;  %v1755_v4 = vadd.f32 %v2964_v55, %v1754_v7  ;;  %v1704_v30 = vmul.f32 1.442695, %v1635_v14  ;;  %v1732_v9 = vmul.f32 1.442695, %v1649_v19 }
 0x38d   : > { %2668 = vst [vmem:[%s4034_s18 + $0x88] sm:$0xff] %v2600_v6   ;;  %2675 = vst [vmem:[%s4034_s18 + $0xc0] sm:$0xff] %v2635_v44   ;;  %v2966_v15 = vpop.eup %2965  ;;  %2981 = vpow2.f32 %v1730_v39  ;;  %v1606_v59 = vmul.f32 1.442695, %v1579_v17 }
 0x38e   : > { %v2968_v12 = vpop.eup %2967  ;;  %v1798_v57 = vmul.f32 %v2966_v15, %v4142_v63  ;;  %v1882_v35 = vmul.f32 %v2966_v15, %v4149_v47  ;;  %v1896_v43 = vmul.f32 %v2966_v15, %v4154_v50  ;;  %v1910_v20 = vmul.f32 %v2966_v15, %v4164_v26 }
 0x38f   : > { %v2970_v60 = vpop.eup %2969  ;;  %v1772_v40 = vadd.f32 %v2962_v32, %v1755_v4  ;;  %2983 = vpow2.f32 %v1604_v8 }
 0x390   : > { %v2972_v23 = vpop.eup %2971  ;;  %v1756_v53 = vadd.f32 %v2970_v60, %v2968_v12  ;;  %2985 = vpow2.f32 %v1676_v10 }
 0x391   : > { %v2974_v34 = vpop.eup %2973  ;;  %2987 = vrcp.f32 %v1772_v40 }
 0x392   : > { %v1757_v45 = vadd.f32 %v2974_v34, %v1756_v53  ;;  %2989 = vpow2.f32 %v1704_v30 }
 0x393   : > { %v2976_v29 = vpop.eup %2975  ;;  %2991 = vpow2.f32 %v1732_v9 }
 0x394   : > { %v1773_v63 = vadd.f32 %v2972_v23, %v1757_v45  ;;  %2993 = vpow2.f32 %v1606_v59 }
 0x395   : > { %v2978_v47 = vpop.eup %2977 }
 0x396   : > { %v2980_v50 = vpop.eup %2979  ;;  %v1799_v26 = vmul.f32 %v2978_v47, %v2954_v41  ;;  %v1883_v36 = vmul.f32 %v2978_v47, %v4181_v16  ;;  %v1897_v46 = vmul.f32 %v2978_v47, %v4194_v62  ;;  %v1911_v54 = vmul.f32 %v2978_v47, %v4199_v33 }
 0x397   : > { %v2982_v58 = vpop.eup %2981  ;;  %2995 = vrcp.f32 %v1773_v63  ;;  %v1758_v61 = vadd.f32 %v2980_v50, %v2976_v29 }
 0x398   : > { %v2535_v18 = vpack.c.bf16 %v1799_v26, %v1798_v57  ;;  %v2570_v52 = vpack.c.bf16 %v1883_v36, %v1882_v35  ;;  %v2605_v37 = vpack.c.bf16 %v1897_v46, %v1896_v43  ;;  %v2640_v3 = vpack.c.bf16 %v1911_v54, %v1910_v20 }
 0x399   : > { %v2984_v0 = vpop.eup %2983  ;;  %v1759_v51 = vadd.f32 %v2982_v58, %v1758_v61 }
 0x39a   : > { %v2986_v42 = vpop.eup %2985  ;;  %2655 = vst [vmem:[%s4034_s18 + $0x20] sm:$0xff] %v2535_v18   ;;  %2662 = vst [vmem:[%s4034_s18 + $0x58] sm:$0xff] %v2570_v52  }
 0x39b   : > { %2669 = vst [vmem:[%s4034_s18 + $0x90] sm:$0xff] %v2605_v37   ;;  %2676 = vst [vmem:[%s4034_s18 + $0xc8] sm:$0xff] %v2640_v3   ;;  %v2988_v16 = vpop.eup %2987  ;;  %v1774_v24 = vadd.f32 %v2984_v0, %v1759_v51 }
 0x39c   : > { %v2990_v25 = vpop.eup %2989  ;;  %v1800_v62 = vmul.f32 %v2988_v16, %v2962_v32  ;;  %v1884_v33 = vmul.f32 %v2988_v16, %v4206_v56  ;;  %v1898_v27 = vmul.f32 %v2988_v16, %v4212_v38  ;;  %v1912_v41 = vmul.f32 %v2988_v16, %v2964_v55 }
 0x39d   : > { %2997 = vrcp.f32 %v1774_v24  ;;  %v1760_v49 = vadd.f32 %v2990_v25, %v2986_v42  ;;  %v2992_v17 = vpop.eup %2991 }
 0x39e   : > { %v2994_v21 = vpop.eup %2993 }
 0x39f   : > { %v1761_v48 = vadd.f32 %v2992_v17, %v1760_v49 }
 0x3a1   : > { %v2996_v31 = vpop.eup %2995  ;;  %v1775_v14 = vadd.f32 %v2994_v21, %v1761_v48 }
 0x3a2   : > { %v1801_v19 = vmul.f32 %v2996_v31, %v2972_v23  ;;  %v1885_v13 = vmul.f32 %v2996_v31, %v2968_v12  ;;  %v1899_v28 = vmul.f32 %v2996_v31, %v2970_v60  ;;  %v1913_v22 = vmul.f32 %v2996_v31, %v2974_v34 }
 0x3a3   : > { %2999 = vrcp.f32 %v1775_v14 }
 0x3a4   : > { %v2540_v56 = vpack.c.bf16 %v1801_v19, %v1800_v62  ;;  %v2575_v5 = vpack.c.bf16 %v1885_v13, %v1884_v33  ;;  %v2610_v38 = vpack.c.bf16 %v1899_v28, %v1898_v27  ;;  %v2645_v2 = vpack.c.bf16 %v1913_v22, %v1912_v41 }
 0x3a6   : > { %2656 = vst [vmem:[%s4034_s18 + $0x28] sm:$0xff] %v2540_v56   ;;  %2663 = vst [vmem:[%s4034_s18 + $0x60] sm:$0xff] %v2575_v5  }
 0x3a7   : > { %2670 = vst [vmem:[%s4034_s18 + $0x98] sm:$0xff] %v2610_v38   ;;  %2677 = vst [vmem:[%s4034_s18 + $0xd0] sm:$0xff] %v2645_v2   ;;  %v2998_v39 = vpop.eup %2997 }
 0x3a8   : > { %v1802_v1 = vmul.f32 %v2998_v39, %v2984_v0  ;;  %v1886_v11 = vmul.f32 %v2998_v39, %v2976_v29  ;;  %v1900_v6 = vmul.f32 %v2998_v39, %v2980_v50  ;;  %v1914_v44 = vmul.f32 %v2998_v39, %v2982_v58 }
 0x3ad   : > { %v3000_v32 = vpop.eup %2999  ;;  %2134 = sbr.rel (!%p4315_p6) target bundleno = 965 (0x3c5), region = 64 }
 0x3ae   : > { %v1803_v7 = vmul.f32 %v3000_v32, %v2994_v21  ;;  %v1887_v8 = vmul.f32 %v3000_v32, %v2986_v42  ;;  %v1901_v55 = vmul.f32 %v3000_v32, %v2990_v25  ;;  %v1915_v10 = vmul.f32 %v3000_v32, %v2992_v17 }
 0x3b0   : > { %v2545_v15 = vpack.c.bf16 %v1803_v7, %v1802_v1  ;;  %v2580_v4 = vpack.c.bf16 %v1887_v8, %v1886_v11  ;;  %v2615_v30 = vpack.c.bf16 %v1901_v55, %v1900_v6  ;;  %v2650_v12 = vpack.c.bf16 %v1915_v10, %v1914_v44 }
 0x3b2   : > { %2657 = vst [vmem:[%s4034_s18 + $0x30] sm:$0xff] %v2545_v15   ;;  %2664 = vst [vmem:[%s4034_s18 + $0x68] sm:$0xff] %v2580_v4  }
 0x3b3   : > { %2671 = vst [vmem:[%s4034_s18 + $0xa0] sm:$0xff] %v2615_v30   ;;  %2678 = vst [vmem:[%s4034_s18 + $0xd8] sm:$0xff] %v2650_v12  }
 0x3b4   : > { %s2135_s16 = smul.u32 14, %s3214_s25 }
 0x3b6   : > { %s2136_s19 = ssub.s32 25, %s2135_s16 }
 0x3b7   : > { %p2137_p11 = scmp.lt.s32.totalorder %s2136_s19, 14 }
 0x3b9   : > { %s4327_s19 = smov (!%p2137_p11, %s2136_s19), 14 }
 0x3ba   : > { %s2443_s26 = sshll.u32 %s4327_s19, 8 }
 0x3bb   : > { %s2141_s27 = ssub.s32 3584, %s2443_s26 }
 0x3bc   : > { %2142 = vsyncadd %s2128_s20, %s2141_s27  ;;  %p2444_p13 = scmp.ne.s32.totalorder %s2443_s26, 0  ;;  %s2509_s29 = smul.u32 896, %s3214_s25 }
 0x3bd   : > { %s2164_s14 = sshll.u32 %s4034_s18, 4  ;;  %s3152_s11 = smov 896   ;;  %s2165_s14 = int_to_ptr.vmem [resolvable:$true] %s2164_s14 }
 0x3be   : > { %s2145_s9 = scalar_lea.hbm %s4279_s6, %s2509_s29  ;;  %2171 = sst [smem:[#allocation14]] %s3152_s11 }
 0x3bf   : > { %s3153_s12 = smov 1600   ;;  %2175 = sst [smem:[#allocation14 + $0x2]] %s4327_s19 }
 0x3c0   : > { %2173 = sst [smem:[#allocation14 + $0x1]] %s3153_s12  ;;  %s3154_s30 = smov 64  }
 0x3c1   : > { %2177 = sst [smem:[#allocation14 + $0x3]] %s3154_s30  ;;  %s3155_s8 = smov 4  }
 0x3c2   : > { %2179 = sst [smem:[#allocation14 + $0x4]] %s3154_s30  ;;  %s3156_s28 = smov [#allocation13]  }
 0x3c3   : > { %2181 = sst [smem:[#allocation14 + $0x5]] %s3155_s8  ;;  %s3157_s13 = smov 0  }
 0x3c4   : > { %2183 = dma.general (%p2444_p13), %s2165_s14, %s2443_s26, %s2145_s9, %s2128_s20, %s3156_s28, [#allocation14], %s3157_s13, 0  }
 0x3c5 PF: > { %s2192_s25 = sand.u32 1, %s3123_s21   ;;  %p4316_p0 = scmp.ne.s32.totalorder %s4292_s10, 0 }
 0x3c6   : > { %s2193_s15 = scalar_lea.sflag [#allocation4], %s2192_s25 }
 0x3c7   : > { %p2761_p12 = pnand %p2296_p4, %p4316_p0 }
 0x3c9   : > { %3118 = dma.done.wait (!%p2761_p12), %s2193_s15, 3584  }
 0x3ca   : > { %3120 = vsyncadd (!%p2761_p12), %s2193_s15, 4294963712  ;;  %s4317_s24 = sld [smem:[#allocation20_spill]]  ;;  %s4318_s17 = sld [smem:[#allocation21_spill]] }
 0x3cb   : > { %s4319_s21 = smov %s3127_s22  ;;  %s4320_s22 = smov %s3131_s23 }
 0x3d0   : > { %p23_p7 = scmp.ge.s32.totalorder %s4317_s24, 4   ;;  %s4321_s23 = smov %s4318_s17 }
 0x3d2   :  { %25 = sbr.rel (!%p23_p7) target bundleno = 11 (0xb), region = 121 }
 0x3d9   :  { %2198 = vsyncpa [#allocation3], 1 }
 0x3da   :  { %2200 = vsyncpa [#allocation3 + $0x1], 1 }
 0x3db   :  { %2201 = vsyncpa [#allocation6], 1 }
 0x3dc   :  { %2203 = vsyncpa [#allocation6 + $0x1], 1 }
 0x3dd   :  { %2204 = vsyncpa [#allocation9], 1 }
 0x3de   :  { %2205 = vsyncpa [#allocation4], 1 }
 0x3df   :  { %2207 = vsyncpa [#allocation4 + $0x1], 1 }

</bundles_post_ra>
